<compile_context>
chip_gen: v6e
topology: v6e:2x2x1
jax: 0.10.0
libtpu: 0.0.40
codegen_flags: <defaults>
</compile_context>

<pallas_src>
import math

import jax
import jax.numpy as jnp
from jax.experimental import pallas as pl
from jax.experimental.pallas import tpu as pltpu

# ----------------------- small BERT-like config -----------------------
VOCAB = 64
MAX_POS = 16
N_LAYERS = 2
HIDDEN = 32          # small stand-in for bert-base hidden_size=768
N_HEADS = 2
HEAD_DIM = HIDDEN // N_HEADS
FFN = 64
HIDDEN_LAYER = 1200  # matches nn.Linear(hidden_size, 1200) in the module
HIDDEN_PAD = 1280    # 1200 padded to a multiple of 128 lanes
N_HAZARD = 10
N_PRODUCT = 22
N_OUT = N_HAZARD + N_PRODUCT   # 32 -> fused classifier matmul needs no column padding
LN_EPS = 1e-12       # BERT LayerNorm eps
BN_EPS = 1e-5        # nn.BatchNorm1d default eps


def _vmem_spec():
    return pl.BlockSpec(memory_space=pltpu.MemorySpace.VMEM)


def _layer_norm(x, g, b, eps=LN_EPS):
    mu = jnp.mean(x, axis=-1, keepdims=True)
    var = jnp.mean(jnp.square(x - mu), axis=-1, keepdims=True)
    return (x - mu) * jax.lax.rsqrt(var + eps) * g + b


def _bf16(x):
    return x.astype(jnp.bfloat16)


# ----------------------- fused Pallas kernel: full forward -----------------------
def fused_forward_kernel(x_ref, bias_ref,
                         wqkv_ref, bqkv_ref, wo_ref, bo_ref,
                         ln1_g_ref, ln1_b_ref,
                         w1_ref, b1_ref, w2_ref, b2_ref,
                         ln2_g_ref, ln2_b_ref,
                         wh_ref, bh_ref, bn_g_ref, bn_b_ref,
                         whead_ref, bhead_ref,
                         logits_ref):
    B, S = bias_ref.shape
    H = x_ref.shape[1]

    x2 = x_ref[...]                                   # (B*S, H) f32, flattened by wrapper
    # Hoist the additive-mask broadcast once (JAX does not CSE broadcast_in_dim):
    # (B, S) -> (B, Sq, Sk) -> tiled along the head-batch axis -> (N_HEADS*B, S, S)
    bias_bss = jnp.broadcast_to(bias_ref[...][:, None, :], (B, S, S))
    bias_hb = jnp.concatenate([bias_bss] * N_HEADS, axis=0)        # (NH*B, S, S) f32

    # static unroll over layers; all stacked weights stay resident in VMEM
    for l in range(N_LAYERS):
        # ---- attention: fused QKV projection, head-batched score/context matmuls ----
        # 1/sqrt(HEAD_DIM) is already folded into the Q columns of wqkv (init time).
        qkv = jnp.dot(_bf16(x2), wqkv_ref[l],
                      preferred_element_type=jnp.float32) + bqkv_ref[l]   # (B*S, 3H) f32
        qkv3 = qkv.reshape(B, S, 3 * H)

        # Stack heads on the batch axis (slices are layout plumbing; the matmuls below
        # are single batched dot_generals over all heads at once).
        q = jnp.concatenate(
            [qkv3[:, :, h * HEAD_DIM:(h + 1) * HEAD_DIM] for h in range(N_HEADS)],
            axis=0)                                                        # (NH*B, S, D)
        k = jnp.concatenate(
            [qkv3[:, :, H + h * HEAD_DIM:H + (h + 1) * HEAD_DIM] for h in range(N_HEADS)],
            axis=0)
        v = jnp.concatenate(
            [qkv3[:, :, 2 * H + h * HEAD_DIM:2 * H + (h + 1) * HEAD_DIM]
             for h in range(N_HEADS)],
            axis=0)

        s = jnp.einsum('bqd,bkd->bqk', _bf16(q), _bf16(k),
                       preferred_element_type=jnp.float32) + bias_hb       # (NH*B, S, S)
        s = s - jnp.max(s, axis=-1, keepdims=True)
        p = jnp.exp(s)
        # TODO(synk): a fully-masked row (all attention_mask==0) would give a near-zero
        # denominator here; not hit with valid inputs, left unguarded.
        p = p * pl.reciprocal(jnp.sum(p, axis=-1, keepdims=True), approx=True)
        ctx = jnp.einsum('bqk,bkd->bqd', _bf16(p), _bf16(v),
                         preferred_element_type=jnp.float32)                # (NH*B, S, D)

        # un-stack heads back onto the hidden axis, then one output-projection matmul
        ctx2 = jnp.concatenate(
            [ctx[h * B:(h + 1) * B] for h in range(N_HEADS)], axis=-1
        ).reshape(B * S, H)
        attn_out = jnp.dot(_bf16(ctx2), wo_ref[l],
                           preferred_element_type=jnp.float32) + bo_ref[l]
        x2 = _layer_norm(x2 + attn_out, ln1_g_ref[l], ln1_b_ref[l])

        # ---- FFN ----
        h1 = jnp.dot(_bf16(x2), w1_ref[l],
                     preferred_element_type=jnp.float32) + b1_ref[l]
        # TODO(synk): HF BERT uses exact erf-GELU; tanh approximation used here.
        h1 = jax.nn.gelu(h1, approximate=True)
        ffn = jnp.dot(_bf16(h1), w2_ref[l],
                      preferred_element_type=jnp.float32) + b2_ref[l]
        x2 = _layer_norm(x2 + ffn, ln2_g_ref[l], ln2_b_ref[l])

    # CLS pooling: outputs.last_hidden_state[:, 0, :]
    pooled = x2.reshape(B, S, H)[:, 0, :]                             # (B, H)

    # Linear(H, 1200), zero-padded to 1280 lanes (pad columns stay exactly zero)
    hcls = jnp.dot(_bf16(pooled), wh_ref[...],
                   preferred_element_type=jnp.float32) + bh_ref[...]  # (B, 1280)
    # BatchNorm1d training-mode: biased batch statistics over the batch axis.
    # TODO(synk): running-stat update / eval-mode stats are not modeled.
    mu = jnp.mean(hcls, axis=0, keepdims=True)
    var = jnp.mean(jnp.square(hcls - mu), axis=0, keepdims=True)
    xn = (hcls - mu) * jax.lax.rsqrt(var + BN_EPS) * bn_g_ref[...] + bn_b_ref[...]
    xn = jnp.maximum(xn, 0.0)                                         # ReLU

    # fused hazard|product classifier: one (B,1280)x(1280,32) matmul; split in wrapper
    logits_ref[...] = jnp.dot(_bf16(xn), whead_ref[...],
                              preferred_element_type=jnp.float32) + bhead_ref[...]


def _cost_estimate(B, S, in_bytes, out_bytes):
    m = B * S
    per_layer = (2 * m * HIDDEN * 3 * HIDDEN                    # fused QKV proj
                 + 2 * B * N_HEADS * S * S * HEAD_DIM * 2       # scores + ctx
                 + 2 * m * HIDDEN * HIDDEN                      # output proj
                 + 2 * m * HIDDEN * FFN * 2)                    # FFN up + down
    flops = (N_LAYERS * per_layer
             + 2 * B * HIDDEN * HIDDEN_PAD                      # hidden_layer
             + 2 * B * HIDDEN_PAD * N_OUT)                      # fused classifiers
    trans = N_LAYERS * (B * N_HEADS * S * S + m * FFN)          # exp + gelu-tanh
    return pl.CostEstimate(flops=flops, transcendentals=trans,
                           bytes_accessed=in_bytes + out_bytes)


# ----------------------- deterministic parameter init -----------------------
def init_params(key):
    keys = jax.random.split(key, 32)
    kit = iter(keys)

    def dense(din, dout):
        return jax.random.normal(next(kit), (din, dout), jnp.float32) * 0.02

    params = {
        'word_emb': dense(VOCAB, HIDDEN),
        'pos_emb': dense(MAX_POS, HIDDEN),
        'type_emb': dense(2, HIDDEN),
        'emb_ln_g': jnp.ones((1, HIDDEN), jnp.float32),
        'emb_ln_b': jnp.zeros((1, HIDDEN), jnp.float32),
    }

    scale = 1.0 / math.sqrt(HEAD_DIM)

    # per-layer weights stacked on a leading L axis so one kernel sees all layers.
    # Matmul weights are stored bf16 (MXU operands); biases / LN params stay f32.
    stacks = {k: [] for k in ('wqkv', 'bqkv', 'wo', 'bo', 'ln1_g', 'ln1_b',
                              'w1', 'b1', 'w2', 'b2', 'ln2_g', 'ln2_b')}
    for _ in range(N_LAYERS):
        wq, wk, wv = dense(HIDDEN, HIDDEN), dense(HIDDEN, HIDDEN), dense(HIDDEN, HIDDEN)
        bq = jnp.zeros((1, HIDDEN), jnp.float32)
        bk = jnp.zeros((1, HIDDEN), jnp.float32)
        bv = jnp.zeros((1, HIDDEN), jnp.float32)
        # fold 1/sqrt(HEAD_DIM) into the Q projection (weight AND bias) at init time
        stacks['wqkv'].append(
            jnp.concatenate([wq * scale, wk, wv], axis=1).astype(jnp.bfloat16))
        stacks['bqkv'].append(jnp.concatenate([bq * scale, bk, bv], axis=1))
        stacks['wo'].append(dense(HIDDEN, HIDDEN).astype(jnp.bfloat16))
        stacks['bo'].append(jnp.zeros((1, HIDDEN), jnp.float32))
        stacks['ln1_g'].append(jnp.ones((1, HIDDEN), jnp.float32))
        stacks['ln1_b'].append(jnp.zeros((1, HIDDEN), jnp.float32))
        stacks['w1'].append(dense(HIDDEN, FFN).astype(jnp.bfloat16))
        stacks['b1'].append(jnp.zeros((1, FFN), jnp.float32))
        stacks['w2'].append(dense(FFN, HIDDEN).astype(jnp.bfloat16))
        stacks['b2'].append(jnp.zeros((1, HIDDEN), jnp.float32))
        stacks['ln2_g'].append(jnp.ones((1, HIDDEN), jnp.float32))
        stacks['ln2_b'].append(jnp.zeros((1, HIDDEN), jnp.float32))
    params.update({k: jnp.stack(v) for k, v in stacks.items()})

    # head: Linear(H,1200) -> BatchNorm1d(1200) -> ReLU -> fused two classifiers.
    # 1200 is padded to 1280 with zeros; padding is inert (0 through BN/ReLU, 0 rows
    # in the classifier weight).
    wh = dense(HIDDEN, HIDDEN_LAYER)
    whaz = dense(HIDDEN_LAYER, N_HAZARD)
    wprod = dense(HIDDEN_LAYER, N_PRODUCT)
    whead = jnp.concatenate([whaz, wprod], axis=1)                # (1200, 32)
    params.update({
        'wh': jnp.pad(wh, ((0, 0), (0, HIDDEN_PAD - HIDDEN_LAYER))).astype(jnp.bfloat16),
        'bh': jnp.zeros((1, HIDDEN_PAD), jnp.float32),
        'bn_g': jnp.ones((1, HIDDEN_PAD), jnp.float32),
        'bn_b': jnp.zeros((1, HIDDEN_PAD), jnp.float32),
        'whead': jnp.pad(whead, ((0, HIDDEN_PAD - HIDDEN_LAYER), (0, 0))).astype(jnp.bfloat16),
        'bhead': jnp.zeros((1, N_OUT), jnp.float32),
    })
    return params


# ----------------------- full forward -----------------------
@jax.jit
def multitask_bert_forward(params, input_ids, attention_mask):
    B, S = input_ids.shape
    # embeddings (gather + LayerNorm are glue, done in plain JAX)
    x = (params['word_emb'][input_ids]
         + params['pos_emb'][:S][None, :, :]
         + params['type_emb'][0][None, None, :])
    # TODO(synk): token_type is hard-coded to 0 (reference never passes token_type_ids).
    x = _layer_norm(x, params['emb_ln_g'], params['emb_ln_b'])
    x2 = x.reshape(B * S, HIDDEN)             # flatten in the wrapper, not in-kernel
    # TODO(synk): dropout (active in PyTorch training mode) is omitted.
    bias = (1.0 - attention_mask.astype(jnp.float32)) * -1e9       # (B, S) additive

    args = (x2, bias,
            params['wqkv'], params['bqkv'], params['wo'], params['bo'],
            params['ln1_g'], params['ln1_b'],
            params['w1'], params['b1'], params['w2'], params['b2'],
            params['ln2_g'], params['ln2_b'],
            params['wh'], params['bh'], params['bn_g'], params['bn_b'],
            params['whead'], params['bhead'])
    in_bytes = sum(int(a.size) * a.dtype.itemsize for a in args)
    out_bytes = B * N_OUT * 4

    logits = pl.pallas_call(
        fused_forward_kernel,
        out_shape=jax.ShapeDtypeStruct((B, N_OUT), jnp.float32),
        in_specs=[_vmem_spec() for _ in args],
        out_specs=_vmem_spec(),
        cost_estimate=_cost_estimate(B, S, in_bytes, out_bytes),
    )(*args)
    return logits[:, :N_HAZARD], logits[:, N_HAZARD:]


if __name__ == "__main__":
    key = jax.random.PRNGKey(0)
    pkey, ikey = jax.random.split(key)
    params = init_params(pkey)

    B, S = 2, 8
    input_ids = jax.random.randint(ikey, (B, S), 0, VOCAB, dtype=jnp.int32)
    attention_mask = jnp.ones((B, S), jnp.int32).at[1, 6:].set(0)

    hazard_logits, product_logits = multitask_bert_forward(
        params, input_ids, attention_mask)
    jax.block_until_ready((hazard_logits, product_logits))

    assert hazard_logits.shape == (B, N_HAZARD)
    assert product_logits.shape == (B, N_PRODUCT)
    assert hazard_logits.dtype == jnp.float32 and product_logits.dtype == jnp.float32
    assert bool(jnp.all(jnp.isfinite(hazard_logits)))
    assert bool(jnp.all(jnp.isfinite(product_logits)))
    print("KERNEL_OK")
</pallas_src>

<mosaic_0001>
module attributes {stable_mosaic.version = 11 : i64} {
  func.func @fused_forward_kernel(%arg0: memref<16x32xf32, #tpu.memory_space<vmem>>, %arg1: memref<2x8xf32, #tpu.memory_space<vmem>>, %arg2: memref<2x32x96xbf16, #tpu.memory_space<vmem>>, %arg3: memref<2x1x96xf32, #tpu.memory_space<vmem>>, %arg4: memref<2x32x32xbf16, #tpu.memory_space<vmem>>, %arg5: memref<2x1x32xf32, #tpu.memory_space<vmem>>, %arg6: memref<2x1x32xf32, #tpu.memory_space<vmem>>, %arg7: memref<2x1x32xf32, #tpu.memory_space<vmem>>, %arg8: memref<2x32x64xbf16, #tpu.memory_space<vmem>>, %arg9: memref<2x1x64xf32, #tpu.memory_space<vmem>>, %arg10: memref<2x64x32xbf16, #tpu.memory_space<vmem>>, %arg11: memref<2x1x32xf32, #tpu.memory_space<vmem>>, %arg12: memref<2x1x32xf32, #tpu.memory_space<vmem>>, %arg13: memref<2x1x32xf32, #tpu.memory_space<vmem>>, %arg14: memref<32x1280xbf16, #tpu.memory_space<vmem>>, %arg15: memref<1x1280xf32, #tpu.memory_space<vmem>>, %arg16: memref<1x1280xf32, #tpu.memory_space<vmem>>, %arg17: memref<1x1280xf32, #tpu.memory_space<vmem>>, %arg18: memref<1280x32xbf16, #tpu.memory_space<vmem>>, %arg19: memref<1x32xf32, #tpu.memory_space<vmem>>, %arg20: memref<2x32xf32, #tpu.memory_space<vmem>>) attributes {dimension_semantics = [], scalar_prefetch = 0 : i64, scratch_operands = 0 : i64, tpu.core_type = #tpu.core_type<tc>} {
    %c0 = arith.constant 0 : index
    %c0_0 = arith.constant 0 : index
    %0 = vector.load %arg0[%c0, %c0_0] : memref<16x32xf32, #tpu.memory_space<vmem>>, vector<16x32xf32>
    %c0_1 = arith.constant 0 : index
    %c0_2 = arith.constant 0 : index
    %1 = vector.load %arg1[%c0_1, %c0_2] : memref<2x8xf32, #tpu.memory_space<vmem>>, vector<2x8xf32>
    %2 = vector.shape_cast %1 : vector<2x8xf32> to vector<2x1x8xf32>
    %3 = vector.shape_cast %2 : vector<2x1x8xf32> to vector<2x1x8xf32>
    %4 = vector.broadcast %3 : vector<2x1x8xf32> to vector<2x8x8xf32>
    %5 = tpu.concatenate %4, %4 in 0 : vector<2x8x8xf32>, vector<2x8x8xf32> -> vector<4x8x8xf32>
    %6 = arith.truncf %0 : vector<16x32xf32> to vector<16x32xbf16>
    %c0_3 = arith.constant 0 : index
    %c0_4 = arith.constant 0 : index
    %c0_5 = arith.constant 0 : index
    %7 = vector.load %arg2[%c0_3, %c0_4, %c0_5] : memref<2x32x96xbf16, #tpu.memory_space<vmem>>, vector<1x32x96xbf16>
    %8 = vector.shape_cast %7 : vector<1x32x96xbf16> to vector<32x96xbf16>
    %cst = arith.constant dense<0.000000e+00> : vector<16x96xf32>
    %9 = tpu.matmul %6, %8, %cst {dimension_numbers = #tpu.dot_dimension_numbers<[1], [0], [0], [1], [0, 0, 1, 1], [], []>} : vector<16x32xbf16>, vector<32x96xbf16>, vector<16x96xf32> -> vector<16x96xf32>
    %c0_6 = arith.constant 0 : index
    %c0_7 = arith.constant 0 : index
    %c0_8 = arith.constant 0 : index
    %10 = vector.load %arg3[%c0_6, %c0_7, %c0_8] : memref<2x1x96xf32, #tpu.memory_space<vmem>>, vector<1x1x96xf32>
    %11 = vector.shape_cast %10 : vector<1x1x96xf32> to vector<1x96xf32>
    %12 = vector.broadcast %11 : vector<1x96xf32> to vector<16x96xf32>
    %13 = arith.addf %9, %12 : vector<16x96xf32>
    %14 = vector.shape_cast %13 : vector<16x96xf32> to vector<2x8x96xf32>
    %15 = vector.extract_strided_slice %14 {offsets = [0, 0, 0], sizes = [2, 8, 16], strides = [1, 1, 1]} : vector<2x8x96xf32> to vector<2x8x16xf32>
    %16 = vector.extract_strided_slice %14 {offsets = [0, 0, 16], sizes = [2, 8, 16], strides = [1, 1, 1]} : vector<2x8x96xf32> to vector<2x8x16xf32>
    %17 = tpu.concatenate %15, %16 in 0 : vector<2x8x16xf32>, vector<2x8x16xf32> -> vector<4x8x16xf32>
    %18 = vector.extract_strided_slice %14 {offsets = [0, 0, 32], sizes = [2, 8, 16], strides = [1, 1, 1]} : vector<2x8x96xf32> to vector<2x8x16xf32>
    %19 = vector.extract_strided_slice %14 {offsets = [0, 0, 48], sizes = [2, 8, 16], strides = [1, 1, 1]} : vector<2x8x96xf32> to vector<2x8x16xf32>
    %20 = tpu.concatenate %18, %19 in 0 : vector<2x8x16xf32>, vector<2x8x16xf32> -> vector<4x8x16xf32>
    %21 = vector.extract_strided_slice %14 {offsets = [0, 0, 64], sizes = [2, 8, 16], strides = [1, 1, 1]} : vector<2x8x96xf32> to vector<2x8x16xf32>
    %22 = vector.extract_strided_slice %14 {offsets = [0, 0, 80], sizes = [2, 8, 16], strides = [1, 1, 1]} : vector<2x8x96xf32> to vector<2x8x16xf32>
    %23 = tpu.concatenate %21, %22 in 0 : vector<2x8x16xf32>, vector<2x8x16xf32> -> vector<4x8x16xf32>
    %24 = arith.truncf %17 : vector<4x8x16xf32> to vector<4x8x16xbf16>
    %25 = arith.truncf %20 : vector<4x8x16xf32> to vector<4x8x16xbf16>
    "tpu.trace_start"() <{level = 10 : i32, message = "bqd,bkd->bqk"}> : () -> ()
    %cst_9 = arith.constant dense<0.000000e+00> : vector<4x8x8xf32>
    %26 = tpu.matmul %24, %25, %cst_9 {dimension_numbers = #tpu.dot_dimension_numbers<[2], [2], [1], [1], [0, 0, 0, 1, 1, 1], [0], [0]>} : vector<4x8x16xbf16>, vector<4x8x16xbf16>, vector<4x8x8xf32> -> vector<4x8x8xf32>
    "tpu.trace_stop"() : () -> ()
    %27 = arith.addf %26, %5 : vector<4x8x8xf32>
    %cst_10 = arith.constant dense<0xFF800000> : vector<4x8xf32>
    %28 = vector.multi_reduction <maximumf>, %27, %cst_10 [2] : vector<4x8x8xf32> to vector<4x8xf32>
    %29 = vector.shape_cast %28 : vector<4x8xf32> to vector<4x8x1xf32>
    %30 = vector.broadcast %29 : vector<4x8x1xf32> to vector<4x8x8xf32>
    %31 = arith.subf %27, %30 : vector<4x8x8xf32>
    %32 = math.exp %31 : vector<4x8x8xf32>
    %cst_11 = arith.constant dense<0.000000e+00> : vector<4x8xf32>
    %33 = vector.multi_reduction <add>, %32, %cst_11 [2] : vector<4x8x8xf32> to vector<4x8xf32>
    %34 = vector.shape_cast %33 : vector<4x8xf32> to vector<4x8x1xf32>
    %35 = tpu.reciprocal %34 {approx = true} : vector<4x8x1xf32> -> vector<4x8x1xf32>
    %36 = vector.broadcast %35 : vector<4x8x1xf32> to vector<4x8x8xf32>
    %37 = arith.mulf %32, %36 : vector<4x8x8xf32>
    %38 = arith.truncf %37 : vector<4x8x8xf32> to vector<4x8x8xbf16>
    %39 = arith.truncf %23 : vector<4x8x16xf32> to vector<4x8x16xbf16>
    "tpu.trace_start"() <{level = 10 : i32, message = "bqk,bkd->bqd"}> : () -> ()
    %cst_12 = arith.constant dense<0.000000e+00> : vector<4x8x16xf32>
    %40 = tpu.matmul %38, %39, %cst_12 {dimension_numbers = #tpu.dot_dimension_numbers<[2], [1], [1], [2], [0, 0, 0, 1, 1, 2], [0], [0]>} : vector<4x8x8xbf16>, vector<4x8x16xbf16>, vector<4x8x16xf32> -> vector<4x8x16xf32>
    "tpu.trace_stop"() : () -> ()
    %41 = vector.extract_strided_slice %40 {offsets = [0, 0, 0], sizes = [2, 8, 16], strides = [1, 1, 1]} : vector<4x8x16xf32> to vector<2x8x16xf32>
    %42 = vector.extract_strided_slice %40 {offsets = [2, 0, 0], sizes = [2, 8, 16], strides = [1, 1, 1]} : vector<4x8x16xf32> to vector<2x8x16xf32>
    %43 = tpu.concatenate %41, %42 in 2 : vector<2x8x16xf32>, vector<2x8x16xf32> -> vector<2x8x32xf32>
    %44 = vector.shape_cast %43 : vector<2x8x32xf32> to vector<16x32xf32>
    %45 = arith.truncf %44 : vector<16x32xf32> to vector<16x32xbf16>
    %c0_13 = arith.constant 0 : index
    %c0_14 = arith.constant 0 : index
    %c0_15 = arith.constant 0 : index
    %46 = vector.load %arg4[%c0_13, %c0_14, %c0_15] : memref<2x32x32xbf16, #tpu.memory_space<vmem>>, vector<1x32x32xbf16>
    %47 = vector.shape_cast %46 : vector<1x32x32xbf16> to vector<32x32xbf16>
    %cst_16 = arith.constant dense<0.000000e+00> : vector<16x32xf32>
    %48 = tpu.matmul %45, %47, %cst_16 {dimension_numbers = #tpu.dot_dimension_numbers<[1], [0], [0], [1], [0, 0, 1, 1], [], []>} : vector<16x32xbf16>, vector<32x32xbf16>, vector<16x32xf32> -> vector<16x32xf32>
    %c0_17 = arith.constant 0 : index
    %c0_18 = arith.constant 0 : index
    %c0_19 = arith.constant 0 : index
    %49 = vector.load %arg5[%c0_17, %c0_18, %c0_19] : memref<2x1x32xf32, #tpu.memory_space<vmem>>, vector<1x1x32xf32>
    %50 = vector.shape_cast %49 : vector<1x1x32xf32> to vector<1x32xf32>
    %51 = vector.broadcast %50 : vector<1x32xf32> to vector<16x32xf32>
    %52 = arith.addf %48, %51 : vector<16x32xf32>
    %53 = arith.addf %0, %52 : vector<16x32xf32>
    %c0_20 = arith.constant 0 : index
    %c0_21 = arith.constant 0 : index
    %c0_22 = arith.constant 0 : index
    %54 = vector.load %arg6[%c0_20, %c0_21, %c0_22] : memref<2x1x32xf32, #tpu.memory_space<vmem>>, vector<1x1x32xf32>
    %55 = vector.shape_cast %54 : vector<1x1x32xf32> to vector<1x32xf32>
    %c0_23 = arith.constant 0 : index
    %c0_24 = arith.constant 0 : index
    %c0_25 = arith.constant 0 : index
    %56 = vector.load %arg7[%c0_23, %c0_24, %c0_25] : memref<2x1x32xf32, #tpu.memory_space<vmem>>, vector<1x1x32xf32>
    %57 = vector.shape_cast %56 : vector<1x1x32xf32> to vector<1x32xf32>
    %cst_26 = arith.constant dense<0.000000e+00> : vector<16xf32>
    %58 = vector.multi_reduction <add>, %53, %cst_26 [1] : vector<16x32xf32> to vector<16xf32>
    %59 = vector.shape_cast %58 : vector<16xf32> to vector<16x1xf32>
    %cst_27 = arith.constant 3.200000e+01 : f32
    %60 = vector.broadcast %cst_27 : f32 to vector<16x1xf32>
    %61 = arith.divf %59, %60 : vector<16x1xf32>
    %62 = vector.broadcast %61 : vector<16x1xf32> to vector<16x32xf32>
    %63 = arith.subf %53, %62 : vector<16x32xf32>
    %64 = arith.mulf %63, %63 : vector<16x32xf32>
    %cst_28 = arith.constant dense<0.000000e+00> : vector<16xf32>
    %65 = vector.multi_reduction <add>, %64, %cst_28 [1] : vector<16x32xf32> to vector<16xf32>
    %66 = vector.shape_cast %65 : vector<16xf32> to vector<16x1xf32>
    %cst_29 = arith.constant 3.200000e+01 : f32
    %67 = vector.broadcast %cst_29 : f32 to vector<16x1xf32>
    %68 = arith.divf %66, %67 : vector<16x1xf32>
    %69 = vector.broadcast %61 : vector<16x1xf32> to vector<16x32xf32>
    %70 = arith.subf %53, %69 : vector<16x32xf32>
    %cst_30 = arith.constant 9.99999996E-13 : f32
    %71 = vector.broadcast %cst_30 : f32 to vector<16x1xf32>
    %72 = arith.addf %68, %71 : vector<16x1xf32>
    %73 = math.rsqrt %72 : vector<16x1xf32>
    %74 = vector.broadcast %73 : vector<16x1xf32> to vector<16x32xf32>
    %75 = arith.mulf %70, %74 : vector<16x32xf32>
    %76 = vector.broadcast %55 : vector<1x32xf32> to vector<16x32xf32>
    %77 = arith.mulf %75, %76 : vector<16x32xf32>
    %78 = vector.broadcast %57 : vector<1x32xf32> to vector<16x32xf32>
    %79 = arith.addf %77, %78 : vector<16x32xf32>
    %80 = arith.truncf %79 : vector<16x32xf32> to vector<16x32xbf16>
    %c0_31 = arith.constant 0 : index
    %c0_32 = arith.constant 0 : index
    %c0_33 = arith.constant 0 : index
    %81 = vector.load %arg8[%c0_31, %c0_32, %c0_33] : memref<2x32x64xbf16, #tpu.memory_space<vmem>>, vector<1x32x64xbf16>
    %82 = vector.shape_cast %81 : vector<1x32x64xbf16> to vector<32x64xbf16>
    %cst_34 = arith.constant dense<0.000000e+00> : vector<16x64xf32>
    %83 = tpu.matmul %80, %82, %cst_34 {dimension_numbers = #tpu.dot_dimension_numbers<[1], [0], [0], [1], [0, 0, 1, 1], [], []>} : vector<16x32xbf16>, vector<32x64xbf16>, vector<16x64xf32> -> vector<16x64xf32>
    %c0_35 = arith.constant 0 : index
    %c0_36 = arith.constant 0 : index
    %c0_37 = arith.constant 0 : index
    %84 = vector.load %arg9[%c0_35, %c0_36, %c0_37] : memref<2x1x64xf32, #tpu.memory_space<vmem>>, vector<1x1x64xf32>
    %85 = vector.shape_cast %84 : vector<1x1x64xf32> to vector<1x64xf32>
    %86 = vector.broadcast %85 : vector<1x64xf32> to vector<16x64xf32>
    %87 = arith.addf %83, %86 : vector<16x64xf32>
    %88 = arith.mulf %87, %87 : vector<16x64xf32>
    %89 = arith.mulf %87, %88 : vector<16x64xf32>
    %cst_38 = arith.constant 4.471500e-02 : f32
    %90 = vector.broadcast %cst_38 : f32 to vector<16x64xf32>
    %91 = arith.mulf %90, %89 : vector<16x64xf32>
    %92 = arith.addf %87, %91 : vector<16x64xf32>
    %cst_39 = arith.constant 0.797884583 : f32
    %93 = vector.broadcast %cst_39 : f32 to vector<16x64xf32>
    %94 = arith.mulf %93, %92 : vector<16x64xf32>
    %95 = math.tanh %94 : vector<16x64xf32>
    %cst_40 = arith.constant 1.000000e+00 : f32
    %96 = vector.broadcast %cst_40 : f32 to vector<16x64xf32>
    %97 = arith.addf %96, %95 : vector<16x64xf32>
    %cst_41 = arith.constant 5.000000e-01 : f32
    %98 = vector.broadcast %cst_41 : f32 to vector<16x64xf32>
    %99 = arith.mulf %98, %97 : vector<16x64xf32>
    %100 = arith.mulf %87, %99 : vector<16x64xf32>
    %101 = arith.truncf %100 : vector<16x64xf32> to vector<16x64xbf16>
    %c0_42 = arith.constant 0 : index
    %c0_43 = arith.constant 0 : index
    %c0_44 = arith.constant 0 : index
    %102 = vector.load %arg10[%c0_42, %c0_43, %c0_44] : memref<2x64x32xbf16, #tpu.memory_space<vmem>>, vector<1x64x32xbf16>
    %103 = vector.shape_cast %102 : vector<1x64x32xbf16> to vector<64x32xbf16>
    %cst_45 = arith.constant dense<0.000000e+00> : vector<16x32xf32>
    %104 = tpu.matmul %101, %103, %cst_45 {dimension_numbers = #tpu.dot_dimension_numbers<[1], [0], [0], [1], [0, 0, 1, 1], [], []>} : vector<16x64xbf16>, vector<64x32xbf16>, vector<16x32xf32> -> vector<16x32xf32>
    %c0_46 = arith.constant 0 : index
    %c0_47 = arith.constant 0 : index
    %c0_48 = arith.constant 0 : index
    %105 = vector.load %arg11[%c0_46, %c0_47, %c0_48] : memref<2x1x32xf32, #tpu.memory_space<vmem>>, vector<1x1x32xf32>
    %106 = vector.shape_cast %105 : vector<1x1x32xf32> to vector<1x32xf32>
    %107 = vector.broadcast %106 : vector<1x32xf32> to vector<16x32xf32>
    %108 = arith.addf %104, %107 : vector<16x32xf32>
    %109 = arith.addf %79, %108 : vector<16x32xf32>
    %c0_49 = arith.constant 0 : index
    %c0_50 = arith.constant 0 : index
    %c0_51 = arith.constant 0 : index
    %110 = vector.load %arg12[%c0_49, %c0_50, %c0_51] : memref<2x1x32xf32, #tpu.memory_space<vmem>>, vector<1x1x32xf32>
    %111 = vector.shape_cast %110 : vector<1x1x32xf32> to vector<1x32xf32>
    %c0_52 = arith.constant 0 : index
    %c0_53 = arith.constant 0 : index
    %c0_54 = arith.constant 0 : index
    %112 = vector.load %arg13[%c0_52, %c0_53, %c0_54] : memref<2x1x32xf32, #tpu.memory_space<vmem>>, vector<1x1x32xf32>
    %113 = vector.shape_cast %112 : vector<1x1x32xf32> to vector<1x32xf32>
    %cst_55 = arith.constant dense<0.000000e+00> : vector<16xf32>
    %114 = vector.multi_reduction <add>, %109, %cst_55 [1] : vector<16x32xf32> to vector<16xf32>
    %115 = vector.shape_cast %114 : vector<16xf32> to vector<16x1xf32>
    %cst_56 = arith.constant 3.200000e+01 : f32
    %116 = vector.broadcast %cst_56 : f32 to vector<16x1xf32>
    %117 = arith.divf %115, %116 : vector<16x1xf32>
    %118 = vector.broadcast %117 : vector<16x1xf32> to vector<16x32xf32>
    %119 = arith.subf %109, %118 : vector<16x32xf32>
    %120 = arith.mulf %119, %119 : vector<16x32xf32>
    %cst_57 = arith.constant dense<0.000000e+00> : vector<16xf32>
    %121 = vector.multi_reduction <add>, %120, %cst_57 [1] : vector<16x32xf32> to vector<16xf32>
    %122 = vector.shape_cast %121 : vector<16xf32> to vector<16x1xf32>
    %cst_58 = arith.constant 3.200000e+01 : f32
    %123 = vector.broadcast %cst_58 : f32 to vector<16x1xf32>
    %124 = arith.divf %122, %123 : vector<16x1xf32>
    %125 = vector.broadcast %117 : vector<16x1xf32> to vector<16x32xf32>
    %126 = arith.subf %109, %125 : vector<16x32xf32>
    %cst_59 = arith.constant 9.99999996E-13 : f32
    %127 = vector.broadcast %cst_59 : f32 to vector<16x1xf32>
    %128 = arith.addf %124, %127 : vector<16x1xf32>
    %129 = math.rsqrt %128 : vector<16x1xf32>
    %130 = vector.broadcast %129 : vector<16x1xf32> to vector<16x32xf32>
    %131 = arith.mulf %126, %130 : vector<16x32xf32>
    %132 = vector.broadcast %111 : vector<1x32xf32> to vector<16x32xf32>
    %133 = arith.mulf %131, %132 : vector<16x32xf32>
    %134 = vector.broadcast %113 : vector<1x32xf32> to vector<16x32xf32>
    %135 = arith.addf %133, %134 : vector<16x32xf32>
    %136 = arith.truncf %135 : vector<16x32xf32> to vector<16x32xbf16>
    %c1 = arith.constant 1 : index
    %c0_60 = arith.constant 0 : index
    %c0_61 = arith.constant 0 : index
    %137 = vector.load %arg2[%c1, %c0_60, %c0_61] : memref<2x32x96xbf16, #tpu.memory_space<vmem>>, vector<1x32x96xbf16>
    %138 = vector.shape_cast %137 : vector<1x32x96xbf16> to vector<32x96xbf16>
    %cst_62 = arith.constant dense<0.000000e+00> : vector<16x96xf32>
    %139 = tpu.matmul %136, %138, %cst_62 {dimension_numbers = #tpu.dot_dimension_numbers<[1], [0], [0], [1], [0, 0, 1, 1], [], []>} : vector<16x32xbf16>, vector<32x96xbf16>, vector<16x96xf32> -> vector<16x96xf32>
    %c1_63 = arith.constant 1 : index
    %c0_64 = arith.constant 0 : index
    %c0_65 = arith.constant 0 : index
    %140 = vector.load %arg3[%c1_63, %c0_64, %c0_65] : memref<2x1x96xf32, #tpu.memory_space<vmem>>, vector<1x1x96xf32>
    %141 = vector.shape_cast %140 : vector<1x1x96xf32> to vector<1x96xf32>
    %142 = vector.broadcast %141 : vector<1x96xf32> to vector<16x96xf32>
    %143 = arith.addf %139, %142 : vector<16x96xf32>
    %144 = vector.shape_cast %143 : vector<16x96xf32> to vector<2x8x96xf32>
    %145 = vector.extract_strided_slice %144 {offsets = [0, 0, 0], sizes = [2, 8, 16], strides = [1, 1, 1]} : vector<2x8x96xf32> to vector<2x8x16xf32>
    %146 = vector.extract_strided_slice %144 {offsets = [0, 0, 16], sizes = [2, 8, 16], strides = [1, 1, 1]} : vector<2x8x96xf32> to vector<2x8x16xf32>
    %147 = tpu.concatenate %145, %146 in 0 : vector<2x8x16xf32>, vector<2x8x16xf32> -> vector<4x8x16xf32>
    %148 = vector.extract_strided_slice %144 {offsets = [0, 0, 32], sizes = [2, 8, 16], strides = [1, 1, 1]} : vector<2x8x96xf32> to vector<2x8x16xf32>
    %149 = vector.extract_strided_slice %144 {offsets = [0, 0, 48], sizes = [2, 8, 16], strides = [1, 1, 1]} : vector<2x8x96xf32> to vector<2x8x16xf32>
    %150 = tpu.concatenate %148, %149 in 0 : vector<2x8x16xf32>, vector<2x8x16xf32> -> vector<4x8x16xf32>
    %151 = vector.extract_strided_slice %144 {offsets = [0, 0, 64], sizes = [2, 8, 16], strides = [1, 1, 1]} : vector<2x8x96xf32> to vector<2x8x16xf32>
    %152 = vector.extract_strided_slice %144 {offsets = [0, 0, 80], sizes = [2, 8, 16], strides = [1, 1, 1]} : vector<2x8x96xf32> to vector<2x8x16xf32>
    %153 = tpu.concatenate %151, %152 in 0 : vector<2x8x16xf32>, vector<2x8x16xf32> -> vector<4x8x16xf32>
    %154 = arith.truncf %147 : vector<4x8x16xf32> to vector<4x8x16xbf16>
    %155 = arith.truncf %150 : vector<4x8x16xf32> to vector<4x8x16xbf16>
    "tpu.trace_start"() <{level = 10 : i32, message = "bqd,bkd->bqk"}> : () -> ()
    %cst_66 = arith.constant dense<0.000000e+00> : vector<4x8x8xf32>
    %156 = tpu.matmul %154, %155, %cst_66 {dimension_numbers = #tpu.dot_dimension_numbers<[2], [2], [1], [1], [0, 0, 0, 1, 1, 1], [0], [0]>} : vector<4x8x16xbf16>, vector<4x8x16xbf16>, vector<4x8x8xf32> -> vector<4x8x8xf32>
    "tpu.trace_stop"() : () -> ()
    %157 = arith.addf %156, %5 : vector<4x8x8xf32>
    %cst_67 = arith.constant dense<0xFF800000> : vector<4x8xf32>
    %158 = vector.multi_reduction <maximumf>, %157, %cst_67 [2] : vector<4x8x8xf32> to vector<4x8xf32>
    %159 = vector.shape_cast %158 : vector<4x8xf32> to vector<4x8x1xf32>
    %160 = vector.broadcast %159 : vector<4x8x1xf32> to vector<4x8x8xf32>
    %161 = arith.subf %157, %160 : vector<4x8x8xf32>
    %162 = math.exp %161 : vector<4x8x8xf32>
    %cst_68 = arith.constant dense<0.000000e+00> : vector<4x8xf32>
    %163 = vector.multi_reduction <add>, %162, %cst_68 [2] : vector<4x8x8xf32> to vector<4x8xf32>
    %164 = vector.shape_cast %163 : vector<4x8xf32> to vector<4x8x1xf32>
    %165 = tpu.reciprocal %164 {approx = true} : vector<4x8x1xf32> -> vector<4x8x1xf32>
    %166 = vector.broadcast %165 : vector<4x8x1xf32> to vector<4x8x8xf32>
    %167 = arith.mulf %162, %166 : vector<4x8x8xf32>
    %168 = arith.truncf %167 : vector<4x8x8xf32> to vector<4x8x8xbf16>
    %169 = arith.truncf %153 : vector<4x8x16xf32> to vector<4x8x16xbf16>
    "tpu.trace_start"() <{level = 10 : i32, message = "bqk,bkd->bqd"}> : () -> ()
    %cst_69 = arith.constant dense<0.000000e+00> : vector<4x8x16xf32>
    %170 = tpu.matmul %168, %169, %cst_69 {dimension_numbers = #tpu.dot_dimension_numbers<[2], [1], [1], [2], [0, 0, 0, 1, 1, 2], [0], [0]>} : vector<4x8x8xbf16>, vector<4x8x16xbf16>, vector<4x8x16xf32> -> vector<4x8x16xf32>
    "tpu.trace_stop"() : () -> ()
    %171 = vector.extract_strided_slice %170 {offsets = [0, 0, 0], sizes = [2, 8, 16], strides = [1, 1, 1]} : vector<4x8x16xf32> to vector<2x8x16xf32>
    %172 = vector.extract_strided_slice %170 {offsets = [2, 0, 0], sizes = [2, 8, 16], strides = [1, 1, 1]} : vector<4x8x16xf32> to vector<2x8x16xf32>
    %173 = tpu.concatenate %171, %172 in 2 : vector<2x8x16xf32>, vector<2x8x16xf32> -> vector<2x8x32xf32>
    %174 = vector.shape_cast %173 : vector<2x8x32xf32> to vector<16x32xf32>
    %175 = arith.truncf %174 : vector<16x32xf32> to vector<16x32xbf16>
    %c1_70 = arith.constant 1 : index
    %c0_71 = arith.constant 0 : index
    %c0_72 = arith.constant 0 : index
    %176 = vector.load %arg4[%c1_70, %c0_71, %c0_72] : memref<2x32x32xbf16, #tpu.memory_space<vmem>>, vector<1x32x32xbf16>
    %177 = vector.shape_cast %176 : vector<1x32x32xbf16> to vector<32x32xbf16>
    %cst_73 = arith.constant dense<0.000000e+00> : vector<16x32xf32>
    %178 = tpu.matmul %175, %177, %cst_73 {dimension_numbers = #tpu.dot_dimension_numbers<[1], [0], [0], [1], [0, 0, 1, 1], [], []>} : vector<16x32xbf16>, vector<32x32xbf16>, vector<16x32xf32> -> vector<16x32xf32>
    %c1_74 = arith.constant 1 : index
    %c0_75 = arith.constant 0 : index
    %c0_76 = arith.constant 0 : index
    %179 = vector.load %arg5[%c1_74, %c0_75, %c0_76] : memref<2x1x32xf32, #tpu.memory_space<vmem>>, vector<1x1x32xf32>
    %180 = vector.shape_cast %179 : vector<1x1x32xf32> to vector<1x32xf32>
    %181 = vector.broadcast %180 : vector<1x32xf32> to vector<16x32xf32>
    %182 = arith.addf %178, %181 : vector<16x32xf32>
    %183 = arith.addf %135, %182 : vector<16x32xf32>
    %c1_77 = arith.constant 1 : index
    %c0_78 = arith.constant 0 : index
    %c0_79 = arith.constant 0 : index
    %184 = vector.load %arg6[%c1_77, %c0_78, %c0_79] : memref<2x1x32xf32, #tpu.memory_space<vmem>>, vector<1x1x32xf32>
    %185 = vector.shape_cast %184 : vector<1x1x32xf32> to vector<1x32xf32>
    %c1_80 = arith.constant 1 : index
    %c0_81 = arith.constant 0 : index
    %c0_82 = arith.constant 0 : index
    %186 = vector.load %arg7[%c1_80, %c0_81, %c0_82] : memref<2x1x32xf32, #tpu.memory_space<vmem>>, vector<1x1x32xf32>
    %187 = vector.shape_cast %186 : vector<1x1x32xf32> to vector<1x32xf32>
    %cst_83 = arith.constant dense<0.000000e+00> : vector<16xf32>
    %188 = vector.multi_reduction <add>, %183, %cst_83 [1] : vector<16x32xf32> to vector<16xf32>
    %189 = vector.shape_cast %188 : vector<16xf32> to vector<16x1xf32>
    %cst_84 = arith.constant 3.200000e+01 : f32
    %190 = vector.broadcast %cst_84 : f32 to vector<16x1xf32>
    %191 = arith.divf %189, %190 : vector<16x1xf32>
    %192 = vector.broadcast %191 : vector<16x1xf32> to vector<16x32xf32>
    %193 = arith.subf %183, %192 : vector<16x32xf32>
    %194 = arith.mulf %193, %193 : vector<16x32xf32>
    %cst_85 = arith.constant dense<0.000000e+00> : vector<16xf32>
    %195 = vector.multi_reduction <add>, %194, %cst_85 [1] : vector<16x32xf32> to vector<16xf32>
    %196 = vector.shape_cast %195 : vector<16xf32> to vector<16x1xf32>
    %cst_86 = arith.constant 3.200000e+01 : f32
    %197 = vector.broadcast %cst_86 : f32 to vector<16x1xf32>
    %198 = arith.divf %196, %197 : vector<16x1xf32>
    %199 = vector.broadcast %191 : vector<16x1xf32> to vector<16x32xf32>
    %200 = arith.subf %183, %199 : vector<16x32xf32>
    %cst_87 = arith.constant 9.99999996E-13 : f32
    %201 = vector.broadcast %cst_87 : f32 to vector<16x1xf32>
    %202 = arith.addf %198, %201 : vector<16x1xf32>
    %203 = math.rsqrt %202 : vector<16x1xf32>
    %204 = vector.broadcast %203 : vector<16x1xf32> to vector<16x32xf32>
    %205 = arith.mulf %200, %204 : vector<16x32xf32>
    %206 = vector.broadcast %185 : vector<1x32xf32> to vector<16x32xf32>
    %207 = arith.mulf %205, %206 : vector<16x32xf32>
    %208 = vector.broadcast %187 : vector<1x32xf32> to vector<16x32xf32>
    %209 = arith.addf %207, %208 : vector<16x32xf32>
    %210 = arith.truncf %209 : vector<16x32xf32> to vector<16x32xbf16>
    %c1_88 = arith.constant 1 : index
    %c0_89 = arith.constant 0 : index
    %c0_90 = arith.constant 0 : index
    %211 = vector.load %arg8[%c1_88, %c0_89, %c0_90] : memref<2x32x64xbf16, #tpu.memory_space<vmem>>, vector<1x32x64xbf16>
    %212 = vector.shape_cast %211 : vector<1x32x64xbf16> to vector<32x64xbf16>
    %cst_91 = arith.constant dense<0.000000e+00> : vector<16x64xf32>
    %213 = tpu.matmul %210, %212, %cst_91 {dimension_numbers = #tpu.dot_dimension_numbers<[1], [0], [0], [1], [0, 0, 1, 1], [], []>} : vector<16x32xbf16>, vector<32x64xbf16>, vector<16x64xf32> -> vector<16x64xf32>
    %c1_92 = arith.constant 1 : index
    %c0_93 = arith.constant 0 : index
    %c0_94 = arith.constant 0 : index
    %214 = vector.load %arg9[%c1_92, %c0_93, %c0_94] : memref<2x1x64xf32, #tpu.memory_space<vmem>>, vector<1x1x64xf32>
    %215 = vector.shape_cast %214 : vector<1x1x64xf32> to vector<1x64xf32>
    %216 = vector.broadcast %215 : vector<1x64xf32> to vector<16x64xf32>
    %217 = arith.addf %213, %216 : vector<16x64xf32>
    %218 = arith.mulf %217, %217 : vector<16x64xf32>
    %219 = arith.mulf %217, %218 : vector<16x64xf32>
    %cst_95 = arith.constant 4.471500e-02 : f32
    %220 = vector.broadcast %cst_95 : f32 to vector<16x64xf32>
    %221 = arith.mulf %220, %219 : vector<16x64xf32>
    %222 = arith.addf %217, %221 : vector<16x64xf32>
    %cst_96 = arith.constant 0.797884583 : f32
    %223 = vector.broadcast %cst_96 : f32 to vector<16x64xf32>
    %224 = arith.mulf %223, %222 : vector<16x64xf32>
    %225 = math.tanh %224 : vector<16x64xf32>
    %cst_97 = arith.constant 1.000000e+00 : f32
    %226 = vector.broadcast %cst_97 : f32 to vector<16x64xf32>
    %227 = arith.addf %226, %225 : vector<16x64xf32>
    %cst_98 = arith.constant 5.000000e-01 : f32
    %228 = vector.broadcast %cst_98 : f32 to vector<16x64xf32>
    %229 = arith.mulf %228, %227 : vector<16x64xf32>
    %230 = arith.mulf %217, %229 : vector<16x64xf32>
    %231 = arith.truncf %230 : vector<16x64xf32> to vector<16x64xbf16>
    %c1_99 = arith.constant 1 : index
    %c0_100 = arith.constant 0 : index
    %c0_101 = arith.constant 0 : index
    %232 = vector.load %arg10[%c1_99, %c0_100, %c0_101] : memref<2x64x32xbf16, #tpu.memory_space<vmem>>, vector<1x64x32xbf16>
    %233 = vector.shape_cast %232 : vector<1x64x32xbf16> to vector<64x32xbf16>
    %cst_102 = arith.constant dense<0.000000e+00> : vector<16x32xf32>
    %234 = tpu.matmul %231, %233, %cst_102 {dimension_numbers = #tpu.dot_dimension_numbers<[1], [0], [0], [1], [0, 0, 1, 1], [], []>} : vector<16x64xbf16>, vector<64x32xbf16>, vector<16x32xf32> -> vector<16x32xf32>
    %c1_103 = arith.constant 1 : index
    %c0_104 = arith.constant 0 : index
    %c0_105 = arith.constant 0 : index
    %235 = vector.load %arg11[%c1_103, %c0_104, %c0_105] : memref<2x1x32xf32, #tpu.memory_space<vmem>>, vector<1x1x32xf32>
    %236 = vector.shape_cast %235 : vector<1x1x32xf32> to vector<1x32xf32>
    %237 = vector.broadcast %236 : vector<1x32xf32> to vector<16x32xf32>
    %238 = arith.addf %234, %237 : vector<16x32xf32>
    %239 = arith.addf %209, %238 : vector<16x32xf32>
    %c1_106 = arith.constant 1 : index
    %c0_107 = arith.constant 0 : index
    %c0_108 = arith.constant 0 : index
    %240 = vector.load %arg12[%c1_106, %c0_107, %c0_108] : memref<2x1x32xf32, #tpu.memory_space<vmem>>, vector<1x1x32xf32>
    %241 = vector.shape_cast %240 : vector<1x1x32xf32> to vector<1x32xf32>
    %c1_109 = arith.constant 1 : index
    %c0_110 = arith.constant 0 : index
    %c0_111 = arith.constant 0 : index
    %242 = vector.load %arg13[%c1_109, %c0_110, %c0_111] : memref<2x1x32xf32, #tpu.memory_space<vmem>>, vector<1x1x32xf32>
    %243 = vector.shape_cast %242 : vector<1x1x32xf32> to vector<1x32xf32>
    %cst_112 = arith.constant dense<0.000000e+00> : vector<16xf32>
    %244 = vector.multi_reduction <add>, %239, %cst_112 [1] : vector<16x32xf32> to vector<16xf32>
    %245 = vector.shape_cast %244 : vector<16xf32> to vector<16x1xf32>
    %cst_113 = arith.constant 3.200000e+01 : f32
    %246 = vector.broadcast %cst_113 : f32 to vector<16x1xf32>
    %247 = arith.divf %245, %246 : vector<16x1xf32>
    %248 = vector.broadcast %247 : vector<16x1xf32> to vector<16x32xf32>
    %249 = arith.subf %239, %248 : vector<16x32xf32>
    %250 = arith.mulf %249, %249 : vector<16x32xf32>
    %cst_114 = arith.constant dense<0.000000e+00> : vector<16xf32>
    %251 = vector.multi_reduction <add>, %250, %cst_114 [1] : vector<16x32xf32> to vector<16xf32>
    %252 = vector.shape_cast %251 : vector<16xf32> to vector<16x1xf32>
    %cst_115 = arith.constant 3.200000e+01 : f32
    %253 = vector.broadcast %cst_115 : f32 to vector<16x1xf32>
    %254 = arith.divf %252, %253 : vector<16x1xf32>
    %255 = vector.broadcast %247 : vector<16x1xf32> to vector<16x32xf32>
    %256 = arith.subf %239, %255 : vector<16x32xf32>
    %cst_116 = arith.constant 9.99999996E-13 : f32
    %257 = vector.broadcast %cst_116 : f32 to vector<16x1xf32>
    %258 = arith.addf %254, %257 : vector<16x1xf32>
    %259 = math.rsqrt %258 : vector<16x1xf32>
    %260 = vector.broadcast %259 : vector<16x1xf32> to vector<16x32xf32>
    %261 = arith.mulf %256, %260 : vector<16x32xf32>
    %262 = vector.broadcast %241 : vector<1x32xf32> to vector<16x32xf32>
    %263 = arith.mulf %261, %262 : vector<16x32xf32>
    %264 = vector.broadcast %243 : vector<1x32xf32> to vector<16x32xf32>
    %265 = arith.addf %263, %264 : vector<16x32xf32>
    %266 = vector.shape_cast %265 : vector<16x32xf32> to vector<2x8x32xf32>
    %267 = vector.extract_strided_slice %266 {offsets = [0, 0, 0], sizes = [2, 1, 32], strides = [1, 1, 1]} : vector<2x8x32xf32> to vector<2x1x32xf32>
    %268 = vector.shape_cast %267 : vector<2x1x32xf32> to vector<2x32xf32>
    %269 = arith.truncf %268 : vector<2x32xf32> to vector<2x32xbf16>
    %c0_117 = arith.constant 0 : index
    %c0_118 = arith.constant 0 : index
    %270 = vector.load %arg14[%c0_117, %c0_118] : memref<32x1280xbf16, #tpu.memory_space<vmem>>, vector<32x1280xbf16>
    %cst_119 = arith.constant dense<0.000000e+00> : vector<2x1280xf32>
    %271 = tpu.matmul %269, %270, %cst_119 {dimension_numbers = #tpu.dot_dimension_numbers<[1], [0], [0], [1], [0, 0, 1, 1], [], []>} : vector<2x32xbf16>, vector<32x1280xbf16>, vector<2x1280xf32> -> vector<2x1280xf32>
    %c0_120 = arith.constant 0 : index
    %c0_121 = arith.constant 0 : index
    %272 = vector.load %arg15[%c0_120, %c0_121] : memref<1x1280xf32, #tpu.memory_space<vmem>>, vector<1x1280xf32>
    %273 = vector.broadcast %272 : vector<1x1280xf32> to vector<2x1280xf32>
    %274 = arith.addf %271, %273 : vector<2x1280xf32>
    %cst_122 = arith.constant dense<0.000000e+00> : vector<1280xf32>
    %275 = vector.multi_reduction <add>, %274, %cst_122 [0] : vector<2x1280xf32> to vector<1280xf32>
    %276 = vector.shape_cast %275 : vector<1280xf32> to vector<1x1280xf32>
    %cst_123 = arith.constant 2.000000e+00 : f32
    %277 = vector.broadcast %cst_123 : f32 to vector<1x1280xf32>
    %278 = arith.divf %276, %277 : vector<1x1280xf32>
    %279 = vector.broadcast %278 : vector<1x1280xf32> to vector<2x1280xf32>
    %280 = arith.subf %274, %279 : vector<2x1280xf32>
    %281 = arith.mulf %280, %280 : vector<2x1280xf32>
    %cst_124 = arith.constant dense<0.000000e+00> : vector<1280xf32>
    %282 = vector.multi_reduction <add>, %281, %cst_124 [0] : vector<2x1280xf32> to vector<1280xf32>
    %283 = vector.shape_cast %282 : vector<1280xf32> to vector<1x1280xf32>
    %cst_125 = arith.constant 2.000000e+00 : f32
    %284 = vector.broadcast %cst_125 : f32 to vector<1x1280xf32>
    %285 = arith.divf %283, %284 : vector<1x1280xf32>
    %286 = vector.broadcast %278 : vector<1x1280xf32> to vector<2x1280xf32>
    %287 = arith.subf %274, %286 : vector<2x1280xf32>
    %cst_126 = arith.constant 9.99999974E-6 : f32
    %288 = vector.broadcast %cst_126 : f32 to vector<1x1280xf32>
    %289 = arith.addf %285, %288 : vector<1x1280xf32>
    %290 = math.rsqrt %289 : vector<1x1280xf32>
    %291 = vector.broadcast %290 : vector<1x1280xf32> to vector<2x1280xf32>
    %292 = arith.mulf %287, %291 : vector<2x1280xf32>
    %c0_127 = arith.constant 0 : index
    %c0_128 = arith.constant 0 : index
    %293 = vector.load %arg16[%c0_127, %c0_128] : memref<1x1280xf32, #tpu.memory_space<vmem>>, vector<1x1280xf32>
    %294 = vector.broadcast %293 : vector<1x1280xf32> to vector<2x1280xf32>
    %295 = arith.mulf %292, %294 : vector<2x1280xf32>
    %c0_129 = arith.constant 0 : index
    %c0_130 = arith.constant 0 : index
    %296 = vector.load %arg17[%c0_129, %c0_130] : memref<1x1280xf32, #tpu.memory_space<vmem>>, vector<1x1280xf32>
    %297 = vector.broadcast %296 : vector<1x1280xf32> to vector<2x1280xf32>
    %298 = arith.addf %295, %297 : vector<2x1280xf32>
    %cst_131 = arith.constant 0.000000e+00 : f32
    %299 = vector.broadcast %cst_131 : f32 to vector<2x1280xf32>
    %300 = arith.maximumf %298, %299 : vector<2x1280xf32>
    %301 = arith.truncf %300 : vector<2x1280xf32> to vector<2x1280xbf16>
    %c0_132 = arith.constant 0 : index
    %c0_133 = arith.constant 0 : index
    %302 = vector.load %arg18[%c0_132, %c0_133] : memref<1280x32xbf16, #tpu.memory_space<vmem>>, vector<1280x32xbf16>
    %cst_134 = arith.constant dense<0.000000e+00> : vector<2x32xf32>
    %303 = tpu.matmul %301, %302, %cst_134 {dimension_numbers = #tpu.dot_dimension_numbers<[1], [0], [0], [1], [0, 0, 1, 1], [], []>} : vector<2x1280xbf16>, vector<1280x32xbf16>, vector<2x32xf32> -> vector<2x32xf32>
    %c0_135 = arith.constant 0 : index
    %c0_136 = arith.constant 0 : index
    %304 = vector.load %arg19[%c0_135, %c0_136] : memref<1x32xf32, #tpu.memory_space<vmem>>, vector<1x32xf32>
    %305 = vector.broadcast %304 : vector<1x32xf32> to vector<2x32xf32>
    %306 = arith.addf %303, %305 : vector<2x32xf32>
    %c0_137 = arith.constant 0 : index
    %c0_138 = arith.constant 0 : index
    %307 = vector.load %arg20[%c0_137, %c0_138] : memref<2x32xf32, #tpu.memory_space<vmem>>, vector<2x32xf32>
    tpu.vector_store %arg20[%c0_137, %c0_138], %306 {strides = array<i32>} : memref<2x32xf32, #tpu.memory_space<vmem>>, vector<2x32xf32>,
    return
  }
}

</mosaic_0001>

<bundles_post_ra>
// kernel: multitask_bert_forward.1
= control target key start
LH: loop header
LB: loop body
LE: loop exit
PB: predicated region body
PF: predicated region fallthrough
CT: control target
= control target key end

     0   :  { %v4204_v0 = vmov 0.0   ;;  %vm4205_vm0 = vmmov 0   ;;  %vm126_vm1 = vcmask 261120   ;;  %s4207_s21 = smov 96   ;;  %vm186_vm2 = vcmask 130048   ;;  %s5220_s2 = inlined_call_operand.vmem [shape: bf16[2,32,96], index: 2, kind: input, shape index: {}]   ;;  %s5221_s0 = inlined_call_operand.vmem [shape: f32[16,32], index: 0, kind: input, shape index: {}]   ;;  %s5222_s3 = inlined_call_operand.vmem [shape: f32[2,1,96], index: 3, kind: input, shape index: {}]   ;;  %s5223_s1 = inlined_call_operand.vmem [shape: f32[2,8], index: 1, kind: input, shape index: {}]   ;;  %s5224_s4 = inlined_call_operand.vmem [shape: bf16[2,32,32], index: 4, kind: input, shape index: {}]   ;;  %s5225_s5 = inlined_call_operand.vmem [shape: f32[2,1,32], index: 5, kind: input, shape index: {}]   ;;  %s5226_s8 = inlined_call_operand.vmem [shape: bf16[2,32,64], index: 8, kind: input, shape index: {}]   ;;  %s5227_s6 = inlined_call_operand.vmem [shape: f32[2,1,32], index: 6, kind: input, shape index: {}]   ;;  %s5228_s7 = inlined_call_operand.vmem [shape: f32[2,1,32], index: 7, kind: input, shape index: {}]   ;;  %s5229_s10 = inlined_call_operand.vmem [shape: bf16[2,64,32], index: 10, kind: input, shape index: {}]   ;;  %s5230_s9 = inlined_call_operand.vmem [shape: f32[2,1,64], index: 9, kind: input, shape index: {}]   ;;  %s5231_s11 = inlined_call_operand.vmem [shape: f32[2,1,32], index: 11, kind: input, shape index: {}]   ;;  %s5232_s12 = inlined_call_operand.vmem [shape: f32[2,1,32], index: 12, kind: input, shape index: {}]   ;;  %s5233_s13 = inlined_call_operand.vmem [shape: f32[2,1,32], index: 13, kind: input, shape index: {}]   ;;  %s5234_s14 = inlined_call_operand.vmem [shape: bf16[32,1280], index: 14, kind: input, shape index: {}]   ;;  %s5235_s18 = inlined_call_operand.vmem [shape: bf16[1280,32], index: 18, kind: input, shape index: {}]   ;;  %s5236_s15 = inlined_call_operand.vmem [shape: f32[1,1280], index: 15, kind: input, shape index: {}]   ;;  %s5237_s16 = inlined_call_operand.vmem [shape: f32[1,1280], index: 16, kind: input, shape index: {}]   ;;  %s5238_s17 = inlined_call_operand.vmem [shape: f32[1,1280], index: 17, kind: input, shape index: {}]   ;;  %s5239_s19 = inlined_call_operand.vmem [shape: f32[1,32], index: 19, kind: input, shape index: {}]   ;;  %s5240_s20 = inlined_call_operand.vmem [shape: f32[2,32], index: 20, kind: output, shape index: {}]  }
   0x1   :  { %5245 = sst [smem:[#allocation2_spill]] %s5220_s2  ;;  %3802 = vmatprep.subr.bf16.mxu0 %v4204_v0  ;;  %3806 = vmatprep.mubr.msk.bf16.mxu0 %vm4205_vm0, %v4204_v0  ;;  %s4206_s2 = smov 112   ;;  %v4208_v29 = vmov 1966171168   ;;  %v81_v31 = vlaneseq  ;;  %vm380_vm3 = vcmask 64512   ;;  %vm434_vm4 = vcmask 1043456  }
   0x2   :  { %5246 = sst [smem:[#allocation3_spill]] %s5221_s0  ;;  %3822 = vmatprep.subr.bf16.mxu1 %v4204_v0  ;;  %3824 = vmatprep.mubr.msk.bf16.mxu1 %vm4205_vm0, %v4204_v0  ;;  %v79_v30 = vunpack.c.l.s4 %v4208_v29  ;;  %vm873_vm5 = vcmask 523264   ;;  %vm1913_vm6 = vcmask 1041409   ;;  %vm2224_vm7 = vcmask 1041408  }
   0x3   :  { %5247 = sst [smem:[#allocation4_spill]] %s5222_s3  ;;  %v4390_v33 = vshrl.u32 %v81_v31, 7  ;;  %s4209_s3 = smov 64   ;;  %vm3431_vm8 = vcmask 254976  }
   0x4   :  { %5248 = sst [smem:[#allocation5_spill]] %s5223_s1  ;;  %v80_v32 = vunpack.c.0.s8 %v79_v30 }
   0x5   :  { %5249 = sst [smem:[#allocation6_spill]] %s5224_s4  ;;  %v4397_v37 = vsub.s32 0, %v4390_v33  ;;  %s4210_s4 = smov 16  }
   0x6   :  { %s5250_s23 = sld [smem:[#allocation2_spill]]  ;;  %v83_v34 = vsub.s32 %v80_v32, %v4390_v33 }
   0x7   :  { %s5251_s26 = sld [smem:[#allocation3_spill]] }
   0x8   :  { %s5252_s30 = sld [smem:[#allocation4_spill]] }
   0x9   :  { %s5253_s24 = sld [smem:[#allocation5_spill]] }
   0xc   :  { %v3998_v1 = vld [vmem:[%s5250_s23 + $0x8] sm:$0xff]   ;;  %v3999_v2 = vld [vmem:[%s5250_s23] sm:$0xff]  }
   0xd   :  { %3803 = vmatpush3.bf16.msra.mxu0 %v3998_v1  ;;  %v4332_v3 = vld [vmem:[%s5251_s26] sm:$0xff]  ;;  %v4337_v4 = vld [vmem:[%s5251_s26 + $0x8] sm:$0xff]  ;;  %s5254_s26 = sld [smem:[#allocation6_spill]] }
   0xe   :  { %3804 = vmatprep.subr.bf16.mxu0 %v4204_v0  ;;  %v102_v5 = vpack.c.bf16 %v4337_v4, %v4332_v3  ;;  %v3438_v7 = vld [vmem:[%s5252_s30] ss:$0 sm:$0xff] }
   0xf   :  { %v3437_v35 = vld.sshfl [vmem:[%s5253_s24] sm:$0x11 pattern:$0x75316420] }
  0x10   :  { %v84_v36 = vrot.slane %v3437_v35, %v83_v34  ;;  %v77_v39 = vcombine.high %v3437_v35, %v3437_v35 }
  0x11   :  { %3805 = vmatpush3.bf16.msra.mxu0 %v3999_v2 }
  0x12   :  { %3810 = vmatprep.subr.bf16.mxu0 %v4204_v0  ;;  %v4400_v38 = vrot.slane %v84_v36, %v4397_v37  ;;  %v91_v42 = vrot.slane %v77_v39, %v83_v34 }
  0x14   :  { %3807 = vmatmul.mubr.msk.bf16.vlgmr.msra.gmra.mxu0 %vm126_vm1, %v102_v5  ;;  %v4405_v46 = vrot.slane %v91_v42, %v4397_v37 }
  0x15   :  { %3812 = vmatprep.mubr.msk.bf16.mxu0 %vm4205_vm0, %v4204_v0 }
  0xd4   :  { %v164_v6 = vpop.f32.mrf.mxu0 }
  0xd5   :  { %v165_v10 = vadd.f32 %v3438_v7, %v164_v6 }
  0xd6   :  { %v3808_v8 = vpop.f32.mrf.mxu0 }
  0xd7   :  { %v4354_v15 = vpack.c.bf16 %v165_v10, %v165_v10 }
  0xd8   :  { %v167_v9 = vpop.f32.mrf.mxu0 }
  0xd9   :  { %v168_v11 = vadd.f32 %v3438_v7, %v167_v9 }
  0xda   :  { %v3809_v12 = vpop.f32.mrf.mxu0 }
  0xdb   :  { %v4349_v13 = vpack.c.bf16 %v168_v11, %v168_v11  ;;  %v3978_v14 = vpack.i.bf16 %v168_v11, %v165_v10 }
  0xdd   :  { %3979 = vrot.lane.b32.xlu0 %v3978_v14, %s4206_s2  ;;  %234 = vrot.lane.b32.xlu1 %v4349_v13, %s4207_s21 }
  0xe1   :  { %184 = vrot.lane.b32.xlu0 %v4354_v15, %s4207_s21 }
 0x14f   :  { %v3980_v16 = vpop.permute.xlu0 %3979  ;;  %v235_v23 = vpop.permute.xlu1 %234 }
 0x150   :  { %v3982_v17 = vunpack.i.h.bf16 %v3980_v16  ;;  %v3981_v18 = vunpack.i.l.bf16 %v3980_v16  ;;  %v240_v24 = vsel %vm186_vm2, %v235_v23, 0 }
 0x152   :  { %v4358_v19 = vpack.c.bf16 %v3982_v17, %v3982_v17  ;;  %v4360_v20 = vpack.c.bf16 %v3981_v18, %v3981_v18 }
 0x153   :  { %v185_v21 = vpop.permute.xlu0 %184 }
 0x154   :  { %v191_v22 = vsel %vm186_vm2, %v185_v21, 0  ;;  %332 = vrot.lane.b32.xlu0 %v4358_v19, %s4207_s21  ;;  %283 = vrot.lane.b32.xlu1 %v4360_v20, %s4207_s21 }
 0x155   :  { %3811 = vmatpush3.bf16.xpose.msra.mxu0 %v191_v22 }
 0x156   :  { %3816 = vmatprep.subr.bf16.mxu0 %v4204_v0 }
 0x15c   :  { %3813 = vmatmul.mubr.msk.bf16.vlgmr.msra.gmra.mxu0 %vm186_vm2, %v4354_v15 }
 0x15d   :  { %3817 = vmatpush3.bf16.xpose.msra.mxu0 %v240_v24  ;;  %3818 = vmatprep.mubr.msk.bf16.mxu0 %vm4205_vm0, %v4204_v0 }
 0x15e   :  { %3828 = vmatprep.subr.bf16.mxu0 %v4204_v0 }
 0x164   :  { %3819 = vmatmul.mubr.msk.bf16.vlgmr.msra.gmra.mxu0 %vm186_vm2, %v4349_v13 }
 0x165   :  { %3830 = vmatprep.mubr.msk.bf16.mxu0 %vm4205_vm0, %v4204_v0 }
 0x1c6   :  { %v333_v25 = vpop.permute.xlu0 %332  ;;  %v284_v26 = vpop.permute.xlu1 %283 }
 0x1c7   :  { %v338_v27 = vsel %vm186_vm2, %v333_v25, 0  ;;  %v289_v28 = vsel %vm186_vm2, %v284_v26, 0 }
 0x1c8   :  { %3823 = vmatpush3.bf16.xpose.msra.mxu1 %v289_v28  ;;  %3829 = vmatpush3.bf16.xpose.msra.mxu0 %v338_v27 }
 0x1c9   :  { %3834 = vmatprep.subr.bf16.mxu1 %v4204_v0  ;;  %3840 = vmatprep.subr.bf16.mxu0 %v4204_v0 }
 0x1cf   :  { %3825 = vmatmul.mubr.msk.bf16.vlgmr.msra.gmra.mxu1 %vm186_vm2, %v4360_v20  ;;  %3831 = vmatmul.mubr.msk.bf16.vlgmr.msra.gmra.mxu0 %vm186_vm2, %v4358_v19 }
 0x1d0   :  { %3836 = vmatprep.mubr.msk.bf16.mxu1 %vm4205_vm0, %v4204_v0  ;;  %3842 = vmatprep.mubr.msk.bf16.mxu0 %vm4205_vm0, %v4204_v0 }
 0x21c   :  { %v227_v40 = vpop.f32.mrf.mxu0 }
 0x21d   :  { %v228_v41 = vadd.f32 %v227_v40, %v4400_v38 }
 0x21e   :  { %v3814_v43 = vpop.f32.mrf.mxu0 }
 0x21f   :  { %v381_v44 = vsel %vm380_vm3, %v228_v41, -inf }
 0x220   :  { %382 = vmax.xlane.f32.xlu1 %v381_v44  ;;  %v230_v45 = vpop.f32.mrf.mxu0 }
 0x222   :  { %v3815_v47 = vpop.f32.mrf.mxu0 }
 0x224   :  { %v276_v48 = vpop.f32.mrf.mxu0 }
 0x225   :  { %v277_v49 = vadd.f32 %v276_v48, %v4405_v46 }
 0x226   :  { %v3820_v50 = vpop.f32.mrf.mxu0 }
 0x227   :  { %v384_v51 = vsel %vm380_vm3, %v277_v49, -inf }
 0x228   :  { %385 = vmax.xlane.f32.xlu0 %v384_v51  ;;  %v279_v52 = vpop.f32.mrf.mxu0 }
 0x22a   :  { %v3821_v53 = vpop.f32.mrf.mxu0 }
 0x22b   :  { %v4000_v53 = vld [vmem:[%s5254_s26 + $0x8] sm:$0xff]  }
 0x28f   :  { %v325_v54 = vpop.f32.mrf.mxu1  ;;  %v374_v55 = vpop.f32.mrf.mxu0 }
 0x290   :  { %v326_v56 = vadd.f32 %v325_v54, %v4400_v38  ;;  %v375_v57 = vadd.f32 %v374_v55, %v4405_v46 }
 0x291   :  { %v3826_v58 = vpop.f32.mrf.mxu1  ;;  %v3832_v59 = vpop.f32.mrf.mxu0 }
 0x292   :  { %v387_v60 = vsel %vm380_vm3, %v326_v56, -inf  ;;  %v390_v61 = vsel %vm380_vm3, %v375_v57, -inf }
 0x293   :  { %v328_v62 = vpop.f32.mrf.mxu1  ;;  %388 = vmax.xlane.f32.xlu0 %v387_v60  ;;  %391 = vmax.xlane.f32.xlu1 %v390_v61  ;;  %v377_v63 = vpop.f32.mrf.mxu0 }
 0x294   :  { %v4001_v62 = vld [vmem:[%s5254_s26] sm:$0xff]  }
 0x295   :  { %v3827_v1 = vpop.f32.mrf.mxu1  ;;  %v3833_v2 = vpop.f32.mrf.mxu0 }
 0x2a4   :  { %478 = vrot.lane.b32.xlu1 %v4349_v13, %s4209_s3 }
 0x2a9   :  { %429 = vrot.lane.b32.xlu0 %v4354_v15, %s4209_s3  ;;  %v383_v5 = vpop.xlane.xlu1 %382 }
 0x2aa   :  { %v393_v6 = vsub.f32 %v228_v41, %v383_v5 }
 0x2ac   :  { %v397_v8 = vmul.f32 1.442695, %v393_v6 }
 0x2ae   :  { %4128 = vpow2.f32 %v397_v8 }
 0x2b1   :  { %v386_v7 = vpop.xlane.xlu0 %385 }
 0x2b2   :  { %v394_v9 = vsub.f32 %v277_v49, %v386_v7 }
 0x2b4   :  { %v399_v10 = vmul.f32 1.442695, %v394_v9 }
 0x2b6   :  { %4130 = vpow2.f32 %v399_v10 }
 0x2bb   :  { %v4129_v11 = vpop.eup %4128 }
 0x2bc   :  { %v405_v14 = vsel %vm380_vm3, %v4129_v11, 0.0 }
 0x2c3   :  { %v4131_v12 = vpop.eup %4130 }
 0x2c4   :  { %v408_v16 = vsel %vm380_vm3, %v4131_v12, 0.0 }
 0x2c8   :  { %406 = vadd.xlane.f32.xlu0 %v405_v14  ;;  %409 = vadd.xlane.f32.xlu1 %v408_v16 }
 0x31c   :  { %v389_v13 = vpop.xlane.xlu0 %388  ;;  %v392_v17 = vpop.xlane.xlu1 %391 }
 0x31d   :  { %v395_v18 = vsub.f32 %v326_v56, %v389_v13  ;;  %v396_v15 = vsub.f32 %v375_v57, %v392_v17 }
 0x31f   :  { %v401_v21 = vmul.f32 1.442695, %v395_v18  ;;  %v403_v22 = vmul.f32 1.442695, %v396_v15  ;;  %v3450_v18 = vld [vmem:[%s5225_s5] ss:$0 sm:$0xff] }
 0x320   :  { %v430_v23 = vpop.permute.xlu0 %429  ;;  %v479_v24 = vpop.permute.xlu1 %478 }
 0x321   :  { %4132 = vpow2.f32 %v401_v21  ;;  %v436_v25 = vsel %vm434_vm4, %v430_v23, 0  ;;  %v484_v26 = vsel %vm434_vm4, %v479_v24, 0 }
 0x322   :  { %4134 = vpow2.f32 %v403_v22  ;;  %3835 = vmatpush3.bf16.msra.mxu1 %v436_v25  ;;  %3841 = vmatpush3.bf16.msra.mxu0 %v484_v26 }
 0x323   :  { %3846 = vmatprep.subr.bf16.mxu1 %v4204_v0  ;;  %3852 = vmatprep.subr.bf16.mxu0 %v4204_v0 }
 0x32e   :  { %v4133_v27 = vpop.eup %4132 }
 0x32f   :  { %v4135_v28 = vpop.eup %4134  ;;  %v411_v29 = vsel %vm380_vm3, %v4133_v27, 0.0 }
 0x330   :  { %412 = vadd.xlane.f32.xlu0 %v411_v29  ;;  %v414_v30 = vsel %vm380_vm3, %v4135_v28, 0.0 }
 0x331   :  { %415 = vadd.xlane.f32.xlu1 %v414_v30 }
 0x342   :  { %526 = vrot.lane.b32.xlu1 %v4360_v20, %s4209_s3 }
 0x346   :  { %574 = vrot.lane.b32.xlu0 %v4358_v19, %s4209_s3 }
 0x351   :  { %v407_v31 = vpop.xlane.xlu0 %406  ;;  %v410_v32 = vpop.xlane.xlu1 %409 }
 0x352   :  { %4136 = vrcp.f32 %v407_v31 }
 0x353   :  { %4138 = vrcp.f32 %v410_v32 }
 0x35f   :  { %v4137_v34 = vpop.eup %4136 }
 0x360   :  { %v4139_v35 = vpop.eup %4138  ;;  %v421_v36 = vmul.f32 %v4137_v34, %v4129_v11 }
 0x361   :  { %v422_v39 = vmul.f32 %v4139_v35, %v4131_v12 }
 0x362   :  { %v425_v40 = vpack.c.bf16 %v421_v36, %v421_v36 }
 0x363   :  { %v426_v41 = vpack.c.bf16 %v422_v39, %v422_v39 }
 0x364   :  { %3837 = vmatmul.mubr.msk.bf16.vlgmr.msra.gmra.mxu1 %vm380_vm3, %v425_v40 }
 0x365   :  { %3843 = vmatmul.mubr.msk.bf16.vlgmr.msra.gmra.mxu0 %vm380_vm3, %v426_v41  ;;  %3848 = vmatprep.mubr.msk.bf16.mxu1 %vm4205_vm0, %v4204_v0 }
 0x366   :  { %3854 = vmatprep.mubr.msk.bf16.mxu0 %vm4205_vm0, %v4204_v0 }
 0x3b9   :  { %v413_v19 = vpop.xlane.xlu0 %412 }
 0x3ba   :  { %4140 = vrcp.f32 %v413_v19  ;;  %v416_v20 = vpop.xlane.xlu1 %415  ;;  %v4003_v19 = vld [vmem:[%s5226_s8] sm:$0xff]  }
 0x3bb   :  { %4142 = vrcp.f32 %v416_v20 }
 0x3bd   :  { %v575_v42 = vpop.permute.xlu0 %574 }
 0x3be   :  { %v580_v43 = vsel %vm434_vm4, %v575_v42, 0  ;;  %v527_v44 = vpop.permute.xlu1 %526 }
 0x3bf   :  { %v532_v45 = vsel %vm434_vm4, %v527_v44, 0  ;;  %3853 = vmatpush3.bf16.msra.mxu0 %v580_v43 }
 0x3c0   :  { %3847 = vmatpush3.bf16.msra.mxu1 %v532_v45  ;;  %3866 = vmatprep.subr.bf16.mxu0 %v4204_v0 }
 0x3c1   :  { %3858 = vmatprep.subr.bf16.mxu1 %v4204_v0 }
 0x3c7   :  { %v4141_v47 = vpop.eup %4140 }
 0x3c8   :  { %v4143_v48 = vpop.eup %4142  ;;  %v423_v49 = vmul.f32 %v4141_v47, %v4133_v27 }
 0x3c9   :  { %v424_v50 = vmul.f32 %v4143_v48, %v4135_v28 }
 0x3ca   :  { %v427_v51 = vpack.c.bf16 %v423_v49, %v423_v49 }
 0x3cb   :  { %v428_v52 = vpack.c.bf16 %v424_v50, %v424_v50  ;;  %v3454_v50 = vld [vmem:[%s5227_s6] ss:$0 sm:$0xff] }
 0x3cc   :  { %3849 = vmatmul.mubr.msk.bf16.vlgmr.msra.gmra.mxu1 %vm380_vm3, %v427_v51 }
 0x3cd   :  { %3855 = vmatmul.mubr.msk.bf16.vlgmr.msra.gmra.mxu0 %vm380_vm3, %v428_v52  ;;  %3862 = vmatprep.mubr.msk.bf16.mxu1 %vm4205_vm0, %v4204_v0 }
 0x3ce   :  { %3870 = vmatprep.mubr.msk.bf16.mxu0 %vm4205_vm0, %v4204_v0  ;;  %3859 = vmatpush3.bf16.msra.mxu1 %v4000_v53 }
 0x3cf   :  { %3860 = vmatprep.subr.bf16.mxu1 %v4204_v0 }
 0x3d2   :  { %3861 = vmatpush3.bf16.msra.mxu1 %v4001_v62  ;;  %v4007_v62 = vld [vmem:[%s5229_s10] sm:$0xff]  }
 0x3d3   :  { %3874 = vmatprep.subr.bf16.mxu1 %v4204_v0 }
 0x424   :  { %v472_v54 = vpop.f32.mrf.mxu1 }
 0x425   :  { %v520_v55 = vpop.f32.mrf.mxu0 }
 0x426   :  { %v3838_v56 = vpop.f32.mrf.mxu1 }
 0x427   :  { %v3844_v57 = vpop.f32.mrf.mxu0 }
 0x428   :  { %v475_v58 = vpop.f32.mrf.mxu1 }
 0x429   :  { %v523_v59 = vpop.f32.mrf.mxu0 }
 0x42a   :  { %v3839_v60 = vpop.f32.mrf.mxu1  ;;  %v4004_v59 = vld [vmem:[%s5229_s10 + $0x18] sm:$0xff]  }
 0x42b   :  { %v3845_v61 = vpop.f32.mrf.mxu0  ;;  %v4005_v60 = vld [vmem:[%s5229_s10 + $0x10] sm:$0xff]  }
 0x42c   :  { %v4006_v61 = vld [vmem:[%s5229_s10 + $0x8] sm:$0xff]  }
 0x48c   :  { %v568_v63 = vpop.f32.mrf.mxu1 }
 0x48d   :  { %v616_v1 = vpop.f32.mrf.mxu0 }
 0x48e   :  { %v3983_v2 = vpack.i.bf16 %v616_v1, %v568_v63  ;;  %v3850_v5 = vpop.f32.mrf.mxu1  ;;  %v3456_v63 = vld [vmem:[%s5230_s9] ss:$0 sm:$0xff] }
 0x48f   :  { %v3856_v6 = vpop.f32.mrf.mxu0 }
 0x490   :  { %3984 = vrot.lane.b32.xlu1 %v3983_v2, %s4210_s4  ;;  %v571_v7 = vpop.f32.mrf.mxu1 }
 0x491   :  { %v619_v8 = vpop.f32.mrf.mxu0 }
 0x492   :  { %v3851_v9 = vpop.f32.mrf.mxu1 }
 0x493   :  { %v3857_v10 = vpop.f32.mrf.mxu0 }
 0x502   :  { %v3985_v11 = vpop.permute.xlu1 %3984 }
 0x503   :  { %v3987_v12 = vunpack.i.h.bf16 %v3985_v11  ;;  %v3986_v14 = vunpack.i.l.bf16 %v3985_v11 }
 0x505   :  { %v631_v16 = vsel %vm186_vm2, %v520_v55, %v3987_v12  ;;  %v630_v13 = vsel %vm186_vm2, %v472_v54, %v3986_v14  ;;  %v3455_v54 = vld [vmem:[%s5228_s7] ss:$0 sm:$0xff] }
 0x506   :  { %v632_v17 = vpack.c.bf16 %v631_v16, %v630_v13 }
 0x508   :  { %3863 = vmatmul.mubr.msk.bf16.vlgmr.msra.gmra.mxu1 %vm126_vm1, %v632_v17 }
 0x509   :  { %3882 = vmatprep.mubr.msk.bf16.mxu1 %vm4205_vm0, %v4204_v0  ;;  %3875 = vmatpush3.bf16.msra.mxu1 %v4004_v59 }
 0x50a   :  { %3876 = vmatprep.subr.bf16.mxu1 %v4204_v0 }
 0x50d   :  { %3877 = vmatpush3.bf16.msra.mxu1 %v4005_v60 }
 0x50e   :  { %3878 = vmatprep.subr.bf16.mxu1 %v4204_v0 }
 0x511   :  { %3879 = vmatpush3.bf16.msra.mxu1 %v4006_v61  ;;  %v3466_v61 = vld [vmem:[%s5232_s12] ss:$0 sm:$0xff] }
 0x512   :  { %3880 = vmatprep.subr.bf16.mxu1 %v4204_v0 }
 0x515   :  { %3881 = vmatpush3.bf16.msra.mxu1 %v4007_v62 }
 0x516   :  { %3900 = vmatprep.subr.bf16.mxu1 %v4204_v0 }
 0x5c8   :  { %v693_v15 = vpop.f32.mrf.mxu1 }
 0x5c9   :  { %v694_v21 = vadd.f32 %v3450_v18, %v693_v15 }
 0x5ca   :  { %v3864_v22 = vpop.f32.mrf.mxu1 }
 0x5cb   :  { %v700_v23 = vadd.f32 %v694_v21, %v4332_v3 }
 0x5cc   :  { %v696_v24 = vpop.f32.mrf.mxu1 }
 0x5cd   :  { %v697_v25 = vadd.f32 %v3450_v18, %v696_v24  ;;  %v704_v26 = vsel %vm126_vm1, %v700_v23, 0.0 }
 0x5ce   :  { %705 = vadd.xlane.f32.xlu0 %v704_v26  ;;  %v3865_v27 = vpop.f32.mrf.mxu1 }
 0x5cf   :  { %v701_v28 = vadd.f32 %v697_v25, %v4337_v4  ;;  %v4002_v4 = vld [vmem:[%s5226_s8 + $0x8] sm:$0xff]  }
 0x5d0   :  { %3867 = vmatpush3.bf16.msra.mxu0 %v4002_v4 }
 0x5d1   :  { %v707_v29 = vsel %vm126_vm1, %v701_v28, 0.0  ;;  %3868 = vmatprep.subr.bf16.mxu0 %v4204_v0 }
 0x5d2   :  { %708 = vadd.xlane.f32.xlu1 %v707_v29 }
 0x5d4   :  { %3869 = vmatpush3.bf16.msra.mxu0 %v4003_v19 }
 0x5d5   :  { %3886 = vmatprep.subr.bf16.mxu0 %v4204_v0 }
 0x657   :  { %v706_v30 = vpop.xlane.xlu0 %705 }
 0x658   :  { %v711_v31 = vmul.f32 0.03125, %v706_v30  ;;  %v3460_v30 = vld [vmem:[%s5231_s11] ss:$0 sm:$0xff] }
 0x65a   :  { %v713_v32 = vsub.f32 %v700_v23, %v711_v31 }
 0x65b   :  { %v709_v34 = vpop.xlane.xlu1 %708 }
 0x65c   :  { %v712_v35 = vmul.f32 0.03125, %v709_v34  ;;  %v715_v36 = vmul.f32 %v713_v32, %v713_v32 }
 0x65e   :  { %v714_v39 = vsub.f32 %v701_v28, %v712_v35  ;;  %v717_v3 = vsel %vm126_vm1, %v715_v36, 0.0 }
 0x65f   :  { %718 = vadd.xlane.f32.xlu0 %v717_v3 }
 0x660   :  { %v716_v40 = vmul.f32 %v714_v39, %v714_v39 }
 0x662   :  { %v720_v41 = vsel %vm126_vm1, %v716_v40, 0.0 }
 0x663   :  { %721 = vadd.xlane.f32.xlu0 %v720_v41 }
 0x6e8   :  { %v719_v20 = vpop.xlane.xlu0 %718 }
 0x6e9   :  { %v723_v42 = vmul.f32 0.03125, %v719_v20 }
 0x6eb   :  { %v725_v43 = vadd.f32 1e-12, %v723_v42 }
 0x6ec   :  { %v722_v44 = vpop.xlane.xlu0 %721 }
 0x6ed   :  { %4144 = vrsqrt.f32 %v725_v43  ;;  %v724_v45 = vmul.f32 0.03125, %v722_v44 }
 0x6ef   :  { %v726_v47 = vadd.f32 1e-12, %v724_v45 }
 0x6f1   :  { %4146 = vrsqrt.f32 %v726_v47 }
 0x6fa   :  { %v4145_v48 = vpop.eup %4144 }
 0x6fb   :  { %v729_v49 = vmul.f32 %v4145_v48, %v713_v32 }
 0x6fd   :  { %v737_v53 = vmul.f32 %v3454_v50, %v729_v49 }
 0x6fe   :  { %v4147_v51 = vpop.eup %4146 }
 0x6ff   :  { %v730_v52 = vmul.f32 %v4147_v51, %v714_v39  ;;  %v745_v56 = vadd.f32 %v3455_v54, %v737_v53  ;;  %v4008_v51 = vld [vmem:[%s5250_s23 + $0x18] sm:$0xff]  }
 0x701   :  { %v738_v55 = vmul.f32 %v3454_v50, %v730_v52  ;;  %v4009_v52 = vld [vmem:[%s5250_s23 + $0x10] sm:$0xff]  }
 0x703   :  { %v746_v57 = vadd.f32 %v3455_v54, %v738_v55 }
 0x705   :  { %v747_v58 = vpack.c.bf16 %v746_v57, %v745_v56 }
 0x707   :  { %3871 = vmatmul.mubr.msk.bf16.vlgmr.msra.gmra.mxu0 %vm126_vm1, %v747_v58 }
 0x708   :  { %3890 = vmatprep.mubr.msk.bf16.mxu0 %vm4205_vm0, %v4204_v0  ;;  %3887 = vmatpush3.bf16.msra.mxu0 %v4008_v51 }
 0x709   :  { %3888 = vmatprep.subr.bf16.mxu0 %v4204_v0 }
 0x70c   :  { %3889 = vmatpush3.bf16.msra.mxu0 %v4009_v52 }
 0x70d   :  { %3894 = vmatprep.subr.bf16.mxu0 %v4204_v0 }
 0x7c7   :  { %v808_v1 = vpop.f32.mrf.mxu0 }
 0x7c8   :  { %v809_v2 = vadd.f32 %v3456_v63, %v808_v1 }
 0x7c9   :  { %v3872_v5 = vpop.f32.mrf.mxu0 }
 0x7ca   :  { %v815_v6 = vmul.f32 %v809_v2, %v809_v2 }
 0x7cb   :  { %v811_v7 = vpop.f32.mrf.mxu0 }
 0x7cc   :  { %v817_v8 = vmul.f32 %v815_v6, %v809_v2  ;;  %v812_v9 = vadd.f32 %v3456_v63, %v811_v7 }
 0x7cd   :  { %v3873_v10 = vpop.f32.mrf.mxu0 }
 0x7ce   :  { %v819_v11 = vmul.f32 0.044715, %v817_v8  ;;  %v816_v12 = vmul.f32 %v812_v9, %v812_v9 }
 0x7d0   :  { %v821_v14 = vadd.f32 %v819_v11, %v809_v2  ;;  %v818_v16 = vmul.f32 %v816_v12, %v812_v9 }
 0x7d2   :  { %v823_v13 = vmul.f32 0.7978846, %v821_v14  ;;  %v820_v17 = vmul.f32 0.044715, %v818_v16 }
 0x7d4   :  { %4148 = vtanh.f32 %v823_v13  ;;  %v822_v18 = vadd.f32 %v820_v17, %v812_v9 }
 0x7d6   :  { %v824_v15 = vmul.f32 0.7978846, %v822_v18 }
 0x7d8   :  { %4150 = vtanh.f32 %v824_v15 }
 0x7e1   :  { %v4149_v21 = vpop.eup %4148 }
 0x7e2   :  { %v827_v22 = vadd.f32 1.0, %v4149_v21 }
 0x7e4   :  { %v829_v24 = vmul.f32 0.5, %v827_v22 }
 0x7e5   :  { %v4151_v23 = vpop.eup %4150 }
 0x7e6   :  { %v828_v25 = vadd.f32 1.0, %v4151_v23  ;;  %v831_v27 = vmul.f32 %v829_v24, %v809_v2  ;;  %v3467_v2 = vld [vmem:[%s5233_s13] ss:$0 sm:$0xff] }
 0x7e8   :  { %v830_v26 = vmul.f32 0.5, %v828_v25 }
 0x7ea   :  { %v832_v28 = vmul.f32 %v830_v26, %v812_v9  ;;  %v3473_v9 = vld [vmem:[%s5252_s30 + $0x1] ss:$0 sm:$0xff] }
 0x7ec   :  { %v833_v29 = vpack.c.bf16 %v832_v28, %v831_v27 }
 0x7ee   :  { %3883 = vmatmul.mubr.msk.bf16.vlgmr.msra.gmra.mxu1 %vm873_vm5, %v833_v29 }
 0x7ef   :  { %3902 = vmatprep.mubr.msk.bf16.mxu1 %vm4205_vm0, %v4204_v0 }
 0x8ae   :  { %v911_v31 = vpop.f32.mrf.mxu1 }
 0x8af   :  { %v912_v32 = vadd.f32 %v3460_v30, %v911_v31 }
 0x8b0   :  { %v3884_v34 = vpop.f32.mrf.mxu1 }
 0x8b1   :  { %v918_v35 = vadd.f32 %v912_v32, %v745_v56 }
 0x8b2   :  { %v914_v36 = vpop.f32.mrf.mxu1 }
 0x8b3   :  { %v915_v39 = vadd.f32 %v3460_v30, %v914_v36  ;;  %v922_v3 = vsel %vm126_vm1, %v918_v35, 0.0 }
 0x8b4   :  { %923 = vadd.xlane.f32.xlu1 %v922_v3  ;;  %v3885_v40 = vpop.f32.mrf.mxu1 }
 0x8b5   :  { %v919_v41 = vadd.f32 %v915_v39, %v746_v57 }
 0x8b7   :  { %v925_v4 = vsel %vm126_vm1, %v919_v41, 0.0 }
 0x8b8   :  { %926 = vadd.xlane.f32.xlu0 %v925_v4 }
 0x93d   :  { %v924_v19 = vpop.xlane.xlu1 %923 }
 0x93e   :  { %v928_v20 = vmul.f32 0.03125, %v924_v19 }
 0x940   :  { %v930_v42 = vsub.f32 %v918_v35, %v928_v20 }
 0x941   :  { %v927_v43 = vpop.xlane.xlu0 %926 }
 0x942   :  { %v929_v44 = vmul.f32 0.03125, %v927_v43  ;;  %v932_v45 = vmul.f32 %v930_v42, %v930_v42 }
 0x944   :  { %v931_v47 = vsub.f32 %v919_v41, %v929_v44  ;;  %v934_v48 = vsel %vm126_vm1, %v932_v45, 0.0 }
 0x945   :  { %935 = vadd.xlane.f32.xlu1 %v934_v48 }
 0x946   :  { %v933_v49 = vmul.f32 %v931_v47, %v931_v47 }
 0x948   :  { %v937_v50 = vsel %vm126_vm1, %v933_v49, 0.0 }
 0x949   :  { %938 = vadd.xlane.f32.xlu0 %v937_v50 }
 0x9ce   :  { %v936_v53 = vpop.xlane.xlu1 %935 }
 0x9cf   :  { %v940_v54 = vmul.f32 0.03125, %v936_v53 }
 0x9d1   :  { %v942_v55 = vadd.f32 1e-12, %v940_v54 }
 0x9d2   :  { %v939_v56 = vpop.xlane.xlu0 %938 }
 0x9d3   :  { %4152 = vrsqrt.f32 %v942_v55  ;;  %v941_v57 = vmul.f32 0.03125, %v939_v56 }
 0x9d5   :  { %v943_v58 = vadd.f32 1e-12, %v941_v57 }
 0x9d7   :  { %4154 = vrsqrt.f32 %v943_v58 }
 0x9e0   :  { %v4153_v59 = vpop.eup %4152 }
 0x9e1   :  { %v946_v60 = vmul.f32 %v4153_v59, %v930_v42 }
 0x9e3   :  { %v954_v1 = vmul.f32 %v3466_v61, %v946_v60 }
 0x9e4   :  { %v4155_v62 = vpop.eup %4154 }
 0x9e5   :  { %v947_v63 = vmul.f32 %v4155_v62, %v931_v47  ;;  %v4528_v6 = vadd.f32 %v3467_v2, %v954_v1 }
 0x9e7   :  { %v955_v5 = vmul.f32 %v3466_v61, %v947_v63 }
 0x9e9   :  { %v4530_v7 = vadd.f32 %v3467_v2, %v955_v5 }
 0x9eb   :  { %v964_v8 = vpack.c.bf16 %v4530_v7, %v4528_v6 }
 0x9ed   :  { %3891 = vmatmul.mubr.msk.bf16.vlgmr.msra.gmra.mxu0 %vm126_vm1, %v964_v8 }
 0x9ee   :  { %3896 = vmatprep.mubr.msk.bf16.mxu0 %vm4205_vm0, %v4204_v0 }
 0xaad   :  { %v1027_v10 = vpop.f32.mrf.mxu0 }
 0xaae   :  { %v1028_v11 = vadd.f32 %v3473_v9, %v1027_v10 }
 0xaaf   :  { %v3892_v12 = vpop.f32.mrf.mxu0 }
 0xab0   :  { %v4540_v14 = vpack.c.bf16 %v1028_v11, %v1028_v11 }
 0xab1   :  { %v1030_v16 = vpop.f32.mrf.mxu0 }
 0xab2   :  { %v1031_v13 = vadd.f32 %v3473_v9, %v1030_v16  ;;  %1047 = vrot.lane.b32.xlu0 %v4540_v14, %s4207_s21 }
 0xab3   :  { %v3893_v17 = vpop.f32.mrf.mxu0 }
 0xab4   :  { %v3988_v18 = vpack.i.bf16 %v1031_v13, %v1028_v11  ;;  %v1043_v15 = vpack.c.bf16 %v1031_v13, %v1031_v13 }
 0xab6   :  { %3989 = vrot.lane.b32.xlu1 %v3988_v18, %s4206_s2 }
 0xaba   :  { %1096 = vrot.lane.b32.xlu1 %v1043_v15, %s4207_s21 }
 0xb24   :  { %v1048_v21 = vpop.permute.xlu0 %1047 }
 0xb25   :  { %v1053_v22 = vsel %vm186_vm2, %v1048_v21, 0 }
 0xb26   :  { %3895 = vmatpush3.bf16.xpose.msra.mxu0 %v1053_v22 }
 0xb27   :  { %3906 = vmatprep.subr.bf16.mxu0 %v4204_v0 }
 0xb28   :  { %v3990_v23 = vpop.permute.xlu1 %3989 }
 0xb29   :  { %v3992_v24 = vunpack.i.h.bf16 %v3990_v23  ;;  %v3991_v25 = vunpack.i.l.bf16 %v3990_v23 }
 0xb2b   :  { %v4548_v26 = vpack.c.bf16 %v3992_v24, %v3992_v24  ;;  %v4550_v27 = vpack.c.bf16 %v3991_v25, %v3991_v25 }
 0xb2c   :  { %v1097_v28 = vpop.permute.xlu1 %1096 }
 0xb2d   :  { %v1102_v29 = vsel %vm186_vm2, %v1097_v28, 0  ;;  %3897 = vmatmul.mubr.msk.bf16.vlgmr.msra.gmra.mxu0 %vm186_vm2, %v4540_v14  ;;  %1194 = vrot.lane.b32.xlu0 %v4548_v26, %s4207_s21 }
 0xb2e   :  { %1145 = vrot.lane.b32.xlu1 %v4550_v27, %s4207_s21  ;;  %3901 = vmatpush3.bf16.xpose.msra.mxu1 %v1102_v29 }
 0xb2f   :  { %3912 = vmatprep.subr.bf16.mxu1 %v4204_v0  ;;  %3908 = vmatprep.mubr.msk.bf16.mxu0 %vm4205_vm0, %v4204_v0 }
 0xb35   :  { %3903 = vmatmul.mubr.msk.bf16.vlgmr.msra.gmra.mxu1 %vm186_vm2, %v1043_v15 }
 0xb36   :  { %3914 = vmatprep.mubr.msk.bf16.mxu1 %vm4205_vm0, %v4204_v0 }
 0xb9f   :  { %v1195_v30 = vpop.permute.xlu0 %1194 }
 0xba0   :  { %v1200_v31 = vsel %vm186_vm2, %v1195_v30, 0  ;;  %v1146_v32 = vpop.permute.xlu1 %1145 }
 0xba1   :  { %v1151_v34 = vsel %vm186_vm2, %v1146_v32, 0  ;;  %3913 = vmatpush3.bf16.xpose.msra.mxu1 %v1200_v31 }
 0xba2   :  { %3907 = vmatpush3.bf16.xpose.msra.mxu0 %v1151_v34  ;;  %3924 = vmatprep.subr.bf16.mxu1 %v4204_v0 }
 0xba3   :  { %3918 = vmatprep.subr.bf16.mxu0 %v4204_v0 }
 0xba8   :  { %3915 = vmatmul.mubr.msk.bf16.vlgmr.msra.gmra.mxu1 %vm186_vm2, %v4548_v26 }
 0xba9   :  { %3909 = vmatmul.mubr.msk.bf16.vlgmr.msra.gmra.mxu0 %vm186_vm2, %v4550_v27  ;;  %3926 = vmatprep.mubr.msk.bf16.mxu1 %vm4205_vm0, %v4204_v0 }
 0xbaa   :  { %3920 = vmatprep.mubr.msk.bf16.mxu0 %vm4205_vm0, %v4204_v0 }
 0xbed   :  { %v1089_v35 = vpop.f32.mrf.mxu0 }
 0xbee   :  { %v1090_v36 = vadd.f32 %v1089_v35, %v4400_v38 }
 0xbef   :  { %v3898_v39 = vpop.f32.mrf.mxu0 }
 0xbf0   :  { %v1242_v3 = vsel %vm380_vm3, %v1090_v36, -inf }
 0xbf1   :  { %1243 = vmax.xlane.f32.xlu1 %v1242_v3  ;;  %v1092_v40 = vpop.f32.mrf.mxu0 }
 0xbf3   :  { %v3899_v41 = vpop.f32.mrf.mxu0 }
 0xbf5   :  { %v1138_v4 = vpop.f32.mrf.mxu1 }
 0xbf6   :  { %v1139_v19 = vadd.f32 %v1138_v4, %v4405_v46 }
 0xbf7   :  { %v3904_v20 = vpop.f32.mrf.mxu1 }
 0xbf8   :  { %v1245_v42 = vsel %vm380_vm3, %v1139_v19, -inf }
 0xbf9   :  { %1246 = vmax.xlane.f32.xlu0 %v1245_v42  ;;  %v1141_v43 = vpop.f32.mrf.mxu1  ;;  %v4010_v42 = vld [vmem:[%s5254_s26 + $0x18] sm:$0xff]  }
 0xbfb   :  { %v3905_v44 = vpop.f32.mrf.mxu1 }
 0xc68   :  { %v1236_v45 = vpop.f32.mrf.mxu1 }
 0xc69   :  { %v1187_v47 = vpop.f32.mrf.mxu0  ;;  %v1237_v48 = vadd.f32 %v1236_v45, %v4405_v46 }
 0xc6a   :  { %v1188_v49 = vadd.f32 %v1187_v47, %v4400_v38  ;;  %v3916_v50 = vpop.f32.mrf.mxu1 }
 0xc6b   :  { %v3910_v51 = vpop.f32.mrf.mxu0  ;;  %v1251_v52 = vsel %vm380_vm3, %v1237_v48, -inf }
 0xc6c   :  { %v1239_v53 = vpop.f32.mrf.mxu1  ;;  %1252 = vmax.xlane.f32.xlu1 %v1251_v52  ;;  %v1248_v54 = vsel %vm380_vm3, %v1188_v49, -inf  ;;  %v4011_v52 = vld [vmem:[%s5254_s26 + $0x10] sm:$0xff]  }
 0xc6d   :  { %1249 = vmax.xlane.f32.xlu0 %v1248_v54  ;;  %v1190_v55 = vpop.f32.mrf.mxu0 }
 0xc6e   :  { %v3917_v56 = vpop.f32.mrf.mxu1 }
 0xc6f   :  { %v3911_v57 = vpop.f32.mrf.mxu0 }
 0xc7a   :  { %v1244_v58 = vpop.xlane.xlu1 %1243 }
 0xc7b   :  { %v1254_v59 = vsub.f32 %v1090_v36, %v1244_v58 }
 0xc7d   :  { %1338 = vrot.lane.b32.xlu1 %v1043_v15, %s4209_s3  ;;  %v1258_v61 = vmul.f32 1.442695, %v1254_v59 }
 0xc82   :  { %v1247_v46 = vpop.xlane.xlu0 %1246 }
 0xc83   :  { %1290 = vrot.lane.b32.xlu0 %v4540_v14, %s4209_s3  ;;  %v1255_v38 = vsub.f32 %v1139_v19, %v1247_v46 }
 0xc85   :  { %v1260_v60 = vmul.f32 1.442695, %v1255_v38 }
 0xc87   :  { %4156 = vpow2.f32 %v1260_v60 }
 0xc88   :  { %4158 = vpow2.f32 %v1258_v61 }
 0xc94   :  { %v4157_v62 = vpop.eup %4156 }
 0xc95   :  { %v4159_v63 = vpop.eup %4158  ;;  %v1269_v1 = vsel %vm380_vm3, %v4157_v62, 0.0 }
 0xc96   :  { %v1266_v2 = vsel %vm380_vm3, %v4159_v63, 0.0 }
 0xca1   :  { %1270 = vadd.xlane.f32.xlu1 %v1269_v1 }
 0xca2   :  { %1267 = vadd.xlane.f32.xlu0 %v1266_v2 }
 0xcf5   :  { %v1253_v5 = vpop.xlane.xlu1 %1252 }
 0xcf6   :  { %v1257_v8 = vsub.f32 %v1237_v48, %v1253_v5  ;;  %v1250_v9 = vpop.xlane.xlu0 %1249  ;;  %v3490_v5 = vld [vmem:[%s5225_s5 + $0x1] ss:$0 sm:$0xff] }
 0xcf7   :  { %v1256_v10 = vsub.f32 %v1188_v49, %v1250_v9 }
 0xcf8   :  { %v1264_v11 = vmul.f32 1.442695, %v1257_v8 }
 0xcf9   :  { %v1262_v12 = vmul.f32 1.442695, %v1256_v10  ;;  %v1339_v14 = vpop.permute.xlu1 %1338 }
 0xcfa   :  { %4160 = vpow2.f32 %v1264_v11  ;;  %v1344_v16 = vsel %vm434_vm4, %v1339_v14, 0  ;;  %v1291_v13 = vpop.permute.xlu0 %1290 }
 0xcfb   :  { %4162 = vpow2.f32 %v1262_v12  ;;  %v1296_v17 = vsel %vm434_vm4, %v1291_v13, 0  ;;  %3925 = vmatpush3.bf16.msra.mxu1 %v1344_v16 }
 0xcfc   :  { %3919 = vmatpush3.bf16.msra.mxu0 %v1296_v17  ;;  %3936 = vmatprep.subr.bf16.mxu1 %v4204_v0 }
 0xcfd   :  { %3930 = vmatprep.subr.bf16.mxu0 %v4204_v0 }
 0xd07   :  { %v4161_v18 = vpop.eup %4160 }
 0xd08   :  { %v4163_v15 = vpop.eup %4162  ;;  %v1275_v21 = vsel %vm380_vm3, %v4161_v18, 0.0 }
 0xd09   :  { %1276 = vadd.xlane.f32.xlu1 %v1275_v21  ;;  %v1272_v22 = vsel %vm380_vm3, %v4163_v15, 0.0 }
 0xd0a   :  { %1273 = vadd.xlane.f32.xlu0 %v1272_v22 }
 0xd1a   :  { %1386 = vrot.lane.b32.xlu1 %v4550_v27, %s4209_s3 }
 0xd20   :  { %1434 = vrot.lane.b32.xlu0 %v4548_v26, %s4209_s3 }
 0xd2a   :  { %v1271_v23 = vpop.xlane.xlu1 %1270 }
 0xd2b   :  { %4164 = vrcp.f32 %v1271_v23  ;;  %v1268_v24 = vpop.xlane.xlu0 %1267 }
 0xd2c   :  { %4166 = vrcp.f32 %v1268_v24 }
 0xd38   :  { %v4165_v25 = vpop.eup %4164 }
 0xd39   :  { %v4167_v28 = vpop.eup %4166  ;;  %v1283_v29 = vmul.f32 %v4165_v25, %v4157_v62 }
 0xd3a   :  { %v1282_v30 = vmul.f32 %v4167_v28, %v4159_v63 }
 0xd3b   :  { %v1287_v31 = vpack.c.bf16 %v1283_v29, %v1283_v29 }
 0xd3c   :  { %v1286_v32 = vpack.c.bf16 %v1282_v30, %v1282_v30 }
 0xd3d   :  { %3927 = vmatmul.mubr.msk.bf16.vlgmr.msra.gmra.mxu1 %vm380_vm3, %v1287_v31  ;;  %v4013_v31 = vld [vmem:[%s5226_s8 + $0x10] sm:$0xff]  }
 0xd3e   :  { %3921 = vmatmul.mubr.msk.bf16.vlgmr.msra.gmra.mxu0 %vm380_vm3, %v1286_v32  ;;  %3938 = vmatprep.mubr.msk.bf16.mxu1 %vm4205_vm0, %v4204_v0 }
 0xd3f   :  { %3932 = vmatprep.mubr.msk.bf16.mxu0 %vm4205_vm0, %v4204_v0 }
 0xd92   :  { %v1277_v26 = vpop.xlane.xlu1 %1276 }
 0xd93   :  { %4168 = vrcp.f32 %v1277_v26  ;;  %v1274_v27 = vpop.xlane.xlu0 %1273 }
 0xd94   :  { %4170 = vrcp.f32 %v1274_v27 }
 0xd96   :  { %v1387_v34 = vpop.permute.xlu1 %1386 }
 0xd97   :  { %v1392_v35 = vsel %vm434_vm4, %v1387_v34, 0  ;;  %v1435_v36 = vpop.permute.xlu0 %1434 }
 0xd98   :  { %v1440_v39 = vsel %vm434_vm4, %v1435_v36, 0  ;;  %3931 = vmatpush3.bf16.msra.mxu0 %v1392_v35 }
 0xd99   :  { %3937 = vmatpush3.bf16.msra.mxu1 %v1440_v39  ;;  %3942 = vmatprep.subr.bf16.mxu0 %v4204_v0 }
 0xd9a   :  { %3950 = vmatprep.subr.bf16.mxu1 %v4204_v0 }
 0xda0   :  { %v4169_v3 = vpop.eup %4168 }
 0xda1   :  { %v4171_v40 = vpop.eup %4170  ;;  %v1285_v41 = vmul.f32 %v4169_v3, %v4161_v18 }
 0xda2   :  { %v1284_v4 = vmul.f32 %v4171_v40, %v4163_v15  ;;  %v3496_v40 = vld [vmem:[%s5227_s6 + $0x1] ss:$0 sm:$0xff] }
 0xda3   :  { %v1289_v19 = vpack.c.bf16 %v1285_v41, %v1285_v41 }
 0xda4   :  { %v1288_v20 = vpack.c.bf16 %v1284_v4, %v1284_v4 }
 0xda5   :  { %3939 = vmatmul.mubr.msk.bf16.vlgmr.msra.gmra.mxu1 %vm380_vm3, %v1289_v19 }
 0xda6   :  { %3933 = vmatmul.mubr.msk.bf16.vlgmr.msra.gmra.mxu0 %vm380_vm3, %v1288_v20  ;;  %3954 = vmatprep.mubr.msk.bf16.mxu1 %vm4205_vm0, %v4204_v0  ;;  %v3497_v20 = vld [vmem:[%s5228_s7 + $0x1] ss:$0 sm:$0xff] }
 0xda7   :  { %3946 = vmatprep.mubr.msk.bf16.mxu0 %vm4205_vm0, %v4204_v0  ;;  %3943 = vmatpush3.bf16.msra.mxu0 %v4010_v42 }
 0xda8   :  { %3944 = vmatprep.subr.bf16.mxu0 %v4204_v0 }
 0xdab   :  { %3945 = vmatpush3.bf16.msra.mxu0 %v4011_v52 }
 0xdac   :  { %3958 = vmatprep.subr.bf16.mxu0 %v4204_v0 }
 0xdfd   :  { %v1380_v43 = vpop.f32.mrf.mxu1 }
 0xdfe   :  { %v1332_v44 = vpop.f32.mrf.mxu0 }
 0xdff   :  { %v3928_v45 = vpop.f32.mrf.mxu1 }
 0xe00   :  { %v3922_v47 = vpop.f32.mrf.mxu0 }
 0xe01   :  { %v1383_v48 = vpop.f32.mrf.mxu1  ;;  %v4014_v47 = vld [vmem:[%s5229_s10 + $0x38] sm:$0xff]  }
 0xe02   :  { %v1335_v49 = vpop.f32.mrf.mxu0  ;;  %v4015_v48 = vld [vmem:[%s5229_s10 + $0x30] sm:$0xff]  }
 0xe03   :  { %v3929_v50 = vpop.f32.mrf.mxu1  ;;  %v4016_v49 = vld [vmem:[%s5229_s10 + $0x28] sm:$0xff]  }
 0xe04   :  { %v3923_v51 = vpop.f32.mrf.mxu0  ;;  %v4017_v50 = vld [vmem:[%s5229_s10 + $0x20] sm:$0xff]  }
 0xe05   :  { %v3503_v51 = vld [vmem:[%s5230_s9 + $0x1] ss:$0 sm:$0xff] }
 0xe65   :  { %v1476_v53 = vpop.f32.mrf.mxu1 }
 0xe66   :  { %v1428_v54 = vpop.f32.mrf.mxu0 }
 0xe67   :  { %v3993_v55 = vpack.i.bf16 %v1476_v53, %v1428_v54  ;;  %v3940_v56 = vpop.f32.mrf.mxu1 }
 0xe68   :  { %v3934_v57 = vpop.f32.mrf.mxu0 }
 0xe69   :  { %3994 = vrot.lane.b32.xlu1 %v3993_v55, %s4210_s4  ;;  %v1479_v46 = vpop.f32.mrf.mxu1 }
 0xe6a   :  { %v1431_v58 = vpop.f32.mrf.mxu0 }
 0xe6b   :  { %v3941_v38 = vpop.f32.mrf.mxu1 }
 0xe6c   :  { %v3935_v59 = vpop.f32.mrf.mxu0 }
 0xedb   :  { %v3995_v60 = vpop.permute.xlu1 %3994 }
 0xedc   :  { %v3997_v61 = vunpack.i.h.bf16 %v3995_v60  ;;  %v3996_v62 = vunpack.i.l.bf16 %v3995_v60 }
 0xede   :  { %v1491_v63 = vsel %vm186_vm2, %v1380_v43, %v3997_v61  ;;  %v1490_v1 = vsel %vm186_vm2, %v1332_v44, %v3996_v62 }
 0xedf   :  { %v1492_v2 = vpack.c.bf16 %v1491_v63, %v1490_v1 }
 0xee1   :  { %3947 = vmatmul.mubr.msk.bf16.vlgmr.msra.gmra.mxu0 %vm126_vm1, %v1492_v2 }
 0xee2   :  { %3966 = vmatprep.mubr.msk.bf16.mxu0 %vm4205_vm0, %v4204_v0  ;;  %3959 = vmatpush3.bf16.msra.mxu0 %v4014_v47 }
 0xee3   :  { %3960 = vmatprep.subr.bf16.mxu0 %v4204_v0 }
 0xee6   :  { %3961 = vmatpush3.bf16.msra.mxu0 %v4015_v48 }
 0xee7   :  { %3962 = vmatprep.subr.bf16.mxu0 %v4204_v0 }
 0xeea   :  { %3963 = vmatpush3.bf16.msra.mxu0 %v4016_v49 }
 0xeeb   :  { %3964 = vmatprep.subr.bf16.mxu0 %v4204_v0 }
 0xeee   :  { %3965 = vmatpush3.bf16.msra.mxu0 %v4017_v50 }
 0xfa1   :  { %v1555_v8 = vpop.f32.mrf.mxu0 }
 0xfa2   :  { %v1556_v9 = vadd.f32 %v3490_v5, %v1555_v8 }
 0xfa3   :  { %v3948_v10 = vpop.f32.mrf.mxu0 }
 0xfa4   :  { %v1562_v11 = vadd.f32 %v1556_v9, %v4528_v6 }
 0xfa5   :  { %v1558_v12 = vpop.f32.mrf.mxu0 }
 0xfa6   :  { %v1559_v14 = vadd.f32 %v3490_v5, %v1558_v12  ;;  %v1568_v16 = vsel %vm126_vm1, %v1562_v11, 0.0 }
 0xfa7   :  { %1569 = vadd.xlane.f32.xlu0 %v1568_v16  ;;  %v3949_v13 = vpop.f32.mrf.mxu0 }
 0xfa8   :  { %v1563_v17 = vadd.f32 %v1559_v14, %v4530_v7  ;;  %v4012_v7 = vld [vmem:[%s5226_s8 + $0x18] sm:$0xff]   ;;  %v3516_v13 = vld [vmem:[%s5231_s11 + $0x1] ss:$0 sm:$0xff] }
 0xfa9   :  { %3951 = vmatpush3.bf16.msra.mxu1 %v4012_v7 }
 0xfaa   :  { %v1571_v18 = vsel %vm126_vm1, %v1563_v17, 0.0  ;;  %3952 = vmatprep.subr.bf16.mxu1 %v4204_v0 }
 0xfab   :  { %1572 = vadd.xlane.f32.xlu1 %v1571_v18 }
 0xfad   :  { %3953 = vmatpush3.bf16.msra.mxu1 %v4013_v31 }
0x1030   :  { %v1570_v15 = vpop.xlane.xlu0 %1569 }
0x1031   :  { %v1574_v21 = vmul.f32 0.03125, %v1570_v15 }
0x1033   :  { %v1576_v22 = vsub.f32 %v1562_v11, %v1574_v21 }
0x1034   :  { %v1573_v23 = vpop.xlane.xlu1 %1572 }
0x1035   :  { %v1575_v24 = vmul.f32 0.03125, %v1573_v23  ;;  %v1578_v25 = vmul.f32 %v1576_v22, %v1576_v22 }
0x1037   :  { %v1577_v28 = vsub.f32 %v1563_v17, %v1575_v24  ;;  %v1580_v6 = vsel %vm126_vm1, %v1578_v25, 0.0 }
0x1038   :  { %1581 = vadd.xlane.f32.xlu0 %v1580_v6 }
0x1039   :  { %v1579_v29 = vmul.f32 %v1577_v28, %v1577_v28 }
0x103b   :  { %v1583_v30 = vsel %vm126_vm1, %v1579_v29, 0.0 }
0x103c   :  { %1584 = vadd.xlane.f32.xlu0 %v1583_v30 }
0x10c1   :  { %v1582_v32 = vpop.xlane.xlu0 %1581 }
0x10c2   :  { %v1586_v26 = vmul.f32 0.03125, %v1582_v32 }
0x10c4   :  { %v1588_v27 = vadd.f32 1e-12, %v1586_v26 }
0x10c5   :  { %v1585_v34 = vpop.xlane.xlu0 %1584 }
0x10c6   :  { %4172 = vrsqrt.f32 %v1588_v27  ;;  %v1587_v35 = vmul.f32 0.03125, %v1585_v34 }
0x10c8   :  { %v1589_v36 = vadd.f32 1e-12, %v1587_v35 }
0x10ca   :  { %4174 = vrsqrt.f32 %v1589_v36 }
0x10d3   :  { %v4173_v39 = vpop.eup %4172 }
0x10d4   :  { %v1592_v3 = vmul.f32 %v4173_v39, %v1576_v22  ;;  %v4018_v39 = vld [vmem:[%s5234_s14 + $0x50] ss:$40 sps:$4 sm:$0xff]  }
0x10d6   :  { %v1600_v19 = vmul.f32 %v3496_v40, %v1592_v3  ;;  %v4211_v3 = vmov 0  }
0x10d7   :  { %v4175_v41 = vpop.eup %4174 }
0x10d8   :  { %v1593_v4 = vmul.f32 %v4175_v41, %v1577_v28  ;;  %v1608_v43 = vadd.f32 %v3497_v20, %v1600_v19  ;;  %v4021_v41 = vld [vmem:[%s5234_s14 + $0x60] ss:$40 sps:$4 sm:$0xff]  }
0x10d9   :  { %v4024_v19 = vld [vmem:[%s5234_s14] ss:$40 sps:$4 sm:$0xff]  }
0x10da   :  { %v1601_v42 = vmul.f32 %v3496_v40, %v1593_v4  ;;  %v4020_v40 = vld [vmem:[%s5234_s14 + $0x54] ss:$40 sps:$4 sm:$0xff]   ;;  %v4023_v4 = vld [vmem:[%s5234_s14 + $0x64] ss:$40 sps:$4 sm:$0xff]  }
0x10db   :  { %2031 = vmatprep.subr.bf16.mxu1 %v4020_v40  ;;  %2113 = vmatprep.subr.bf16.mxu0 %v4023_v4  ;;  %v4068_v40 = vld [vmem:[%s5235_s18 + $0x48] sm:$0xff]  }
0x10dc   :  { %v1609_v44 = vadd.f32 %v3497_v20, %v1601_v42  ;;  %v4026_v20 = vld [vmem:[%s5234_s14 + $0x4] ss:$40 sps:$4 sm:$0xff]   ;;  %v4027_v42 = vld [vmem:[%s5234_s14 + $0x10] ss:$40 sps:$4 sm:$0xff]  }
0x10dd   :  { %v4070_v4 = vld [vmem:[%s5235_s18 + $0x8] sm:$0xff]  }
0x10de   :  { %v1610_v45 = vpack.c.bf16 %v1609_v44, %v1608_v43 }
0x10e0   :  { %3955 = vmatmul.mubr.msk.bf16.vlgmr.msra.gmra.mxu1 %vm126_vm1, %v1610_v45  ;;  %v4035_v45 = vld [vmem:[%s5234_s14 + $0x74] ss:$40 sps:$4 sm:$0xff]  }
0x10e1   :  { %2051 = vmatprep.mubr.bf16.mxu1 %v4211_v3  ;;  %2032 = vmatpush1.bf16.msra.mxu1 %v4018_v39  ;;  %v4066_v39 = vld [vmem:[%s5235_s18 + $0x10] sm:$0xff]  }
0x10e2   :  { %2033 = vmatprep.subr.bf16.mxu1 %v4026_v20  ;;  %v4072_v20 = vld [vmem:[%s5235_s18 + $0x40] sm:$0xff]  }
0x10e5   :  { %2034 = vmatpush1.bf16.msra.mxu1 %v4024_v19  ;;  %v4071_v19 = vld [vmem:[%s5235_s18 + $0x98] sm:$0xff]  }
0x11a0   :  { %v1673_v52 = vpop.f32.mrf.mxu1 }
0x11a1   :  { %v1674_v53 = vadd.f32 %v3503_v51, %v1673_v52 }
0x11a2   :  { %v3956_v54 = vpop.f32.mrf.mxu1 }
0x11a3   :  { %v1680_v55 = vmul.f32 %v1674_v53, %v1674_v53  ;;  %v3524_v54 = vld [vmem:[%s5232_s12 + $0x1] ss:$0 sm:$0xff] }
0x11a4   :  { %v1676_v56 = vpop.f32.mrf.mxu1 }
0x11a5   :  { %v1682_v57 = vmul.f32 %v1680_v55, %v1674_v53  ;;  %v1677_v46 = vadd.f32 %v3503_v51, %v1676_v56 }
0x11a6   :  { %v3957_v58 = vpop.f32.mrf.mxu1 }
0x11a7   :  { %v1684_v38 = vmul.f32 0.044715, %v1682_v57  ;;  %v1681_v59 = vmul.f32 %v1677_v46, %v1677_v46 }
0x11a9   :  { %v1686_v0 = vadd.f32 %v1684_v38, %v1674_v53  ;;  %v1683_v60 = vmul.f32 %v1681_v59, %v1677_v46 }
0x11ab   :  { %v1688_v61 = vmul.f32 0.7978846, %v1686_v0  ;;  %v1685_v62 = vmul.f32 0.044715, %v1683_v60 }
0x11ad   :  { %4176 = vtanh.f32 %v1688_v61  ;;  %v1687_v63 = vadd.f32 %v1685_v62, %v1677_v46 }
0x11af   :  { %v1689_v1 = vmul.f32 0.7978846, %v1687_v63 }
0x11b1   :  { %4178 = vtanh.f32 %v1689_v1 }
0x11ba   :  { %v4177_v2 = vpop.eup %4176 }
0x11bb   :  { %v1692_v5 = vadd.f32 1.0, %v4177_v2 }
0x11bd   :  { %v1694_v9 = vmul.f32 0.5, %v1692_v5  ;;  %v4030_v5 = vld [vmem:[%s5234_s14 + $0x58] ss:$40 sps:$4 sm:$0xff]  }
0x11be   :  { %v4179_v8 = vpop.eup %4178 }
0x11bf   :  { %v1693_v10 = vadd.f32 1.0, %v4179_v8  ;;  %v1696_v12 = vmul.f32 %v1694_v9, %v1674_v53  ;;  %v4033_v8 = vld [vmem:[%s5234_s14 + $0x70] ss:$40 sps:$4 sm:$0xff]  }
0x11c1   :  { %v1695_v11 = vmul.f32 0.5, %v1693_v10  ;;  %v4038_v10 = vld [vmem:[%s5234_s14 + $0xc] ss:$40 sps:$4 sm:$0xff]  }
0x11c3   :  { %v1697_v14 = vmul.f32 %v1695_v11, %v1677_v46  ;;  %v3525_v46 = vld [vmem:[%s5233_s13 + $0x1] ss:$0 sm:$0xff]  ;;  %v4041_v11 = vld [vmem:[%s5234_s14 + $0x24] ss:$40 sps:$4 sm:$0xff]  }
0x11c5   :  { %v1698_v16 = vpack.c.bf16 %v1697_v14, %v1696_v12  ;;  %v4036_v12 = vld [vmem:[%s5234_s14 + $0x8] ss:$40 sps:$4 sm:$0xff]  }
0x11c6   :  { %v4039_v14 = vld [vmem:[%s5234_s14 + $0x20] ss:$40 sps:$4 sm:$0xff]  }
0x11c7   :  { %3967 = vmatmul.mubr.msk.bf16.vlgmr.msra.gmra.mxu0 %vm873_vm5, %v1698_v16  ;;  %v4044_v16 = vld [vmem:[%s5234_s14 + $0x6c] ss:$40 sps:$4 sm:$0xff]  }
0x11c8   :  { %2133 = vmatprep.mubr.bf16.mxu0 %v4211_v3  ;;  %2114 = vmatpush1.bf16.msra.mxu0 %v4021_v41  ;;  %v4069_v41 = vld [vmem:[%s5235_s18 + $0xd8] sm:$0xff]  }
0x1287   :  { %v1777_v17 = vpop.f32.mrf.mxu0 }
0x1288   :  { %v1778_v18 = vadd.f32 %v3516_v13, %v1777_v17  ;;  %v4047_v17 = vld [vmem:[%s5234_s14 + $0x1c] ss:$40 sps:$4 sm:$0xff]  }
0x1289   :  { %v3968_v15 = vpop.f32.mrf.mxu0 }
0x128a   :  { %v1784_v21 = vadd.f32 %v1778_v18, %v1608_v43  ;;  %v4029_v43 = vld [vmem:[%s5234_s14 + $0x14] ss:$40 sps:$4 sm:$0xff]   ;;  %v4045_v18 = vld [vmem:[%s5234_s14 + $0x18] ss:$40 sps:$4 sm:$0xff]  }
0x128b   :  { %v1780_v22 = vpop.f32.mrf.mxu0  ;;  %2115 = vmatprep.subr.bf16.mxu0 %v4029_v43  ;;  %v4048_v15 = vld [vmem:[%s5235_s18 + $0x78] sm:$0xff]   ;;  %v4074_v43 = vld [vmem:[%s5235_s18] sm:$0xff]  }
0x128c   :  { %v1781_v23 = vadd.f32 %v3516_v13, %v1780_v22  ;;  %v1790_v24 = vsel %vm126_vm1, %v1784_v21, 0.0  ;;  %2116 = vmatpush1.bf16.msra.mxu0 %v4027_v42  ;;  %v4042_v13 = vld [vmem:[%s5234_s14 + $0x68] ss:$40 sps:$4 sm:$0xff]  }
0x128d   :  { %1791 = vadd.xlane.f32.xlu0 %v1790_v24  ;;  %v3969_v25 = vpop.f32.mrf.mxu0  ;;  %2195 = vmatprep.subr.bf16.mxu0 %v4035_v45  ;;  %v4050_v22 = vld [vmem:[%s5235_s18 + $0x70] sm:$0xff]   ;;  %v4052_v24 = vld [vmem:[%s5235_s18 + $0x68] sm:$0xff]  }
0x128e   :  { %v1785_v28 = vadd.f32 %v1781_v23, %v1609_v44  ;;  %v4032_v44 = vld [vmem:[%s5234_s14 + $0x5c] ss:$40 sps:$4 sm:$0xff]   ;;  %v4051_v23 = vld [vmem:[%s5235_s18 + $0x30] sm:$0xff]   ;;  %v4076_v45 = vld [vmem:[%s5235_s18 + $0xc8] sm:$0xff]  }
0x128f   :  { %2072 = vmatprep.subr.bf16.mxu1 %v4032_v44  ;;  %v4053_v25 = vld [vmem:[%s5235_s18 + $0xf8] sm:$0xff]   ;;  %v4073_v42 = vld [vmem:[%s5235_s18 + $0xd0] sm:$0xff]  }
0x1290   :  { %v1793_v6 = vsel %vm126_vm1, %v1785_v28, 0.0  ;;  %v4075_v44 = vld [vmem:[%s5235_s18 + $0x90] sm:$0xff]  }
0x1291   :  { %1794 = vadd.xlane.f32.xlu1 %v1793_v6  ;;  %v4055_v6 = vld [vmem:[%s5235_s18 + $0xb8] sm:$0xff]  }
0x1316   :  { %v1792_v29 = vpop.xlane.xlu0 %1791 }
0x1317   :  { %v1796_v30 = vmul.f32 0.03125, %v1792_v29  ;;  %v4056_v29 = vld [vmem:[%s5235_s18 + $0x60] sm:$0xff]  }
0x1319   :  { %v1798_v7 = vsub.f32 %v1784_v21, %v1796_v30  ;;  %v4049_v21 = vld [vmem:[%s5235_s18 + $0x38] sm:$0xff]   ;;  %v4057_v30 = vld [vmem:[%s5235_s18 + $0xf0] sm:$0xff]  }
0x131a   :  { %v1795_v31 = vpop.xlane.xlu1 %1794 }
0x131b   :  { %v1797_v32 = vmul.f32 0.03125, %v1795_v31  ;;  %v1800_v26 = vmul.f32 %v1798_v7, %v1798_v7  ;;  %v4059_v31 = vld [vmem:[%s5235_s18 + $0xb0] sm:$0xff]  }
0x131d   :  { %v1799_v27 = vsub.f32 %v1785_v28, %v1797_v32  ;;  %v1802_v34 = vsel %vm126_vm1, %v1800_v26, 0.0  ;;  %v4054_v28 = vld [vmem:[%s5235_s18 + $0x28] sm:$0xff]   ;;  %v4060_v32 = vld [vmem:[%s5235_s18 + $0x58] sm:$0xff]  }
0x131e   :  { %1803 = vadd.xlane.f32.xlu0 %v1802_v34  ;;  %v4061_v26 = vld [vmem:[%s5235_s18 + $0xe8] sm:$0xff]  }
0x131f   :  { %v1801_v35 = vmul.f32 %v1799_v27, %v1799_v27  ;;  %v4063_v34 = vld [vmem:[%s5235_s18 + $0xa8] sm:$0xff]  }
0x1321   :  { %v1805_v36 = vsel %vm126_vm1, %v1801_v35, 0.0  ;;  %v4064_v35 = vld [vmem:[%s5235_s18 + $0x50] sm:$0xff]  }
0x1322   :  { %1806 = vadd.xlane.f32.xlu1 %v1805_v36  ;;  %v4065_v36 = vld [vmem:[%s5235_s18 + $0xe0] sm:$0xff]  }
0x13a7   :  { %v1804_v47 = vpop.xlane.xlu0 %1803 }
0x13a8   :  { %v1808_v48 = vmul.f32 0.03125, %v1804_v47  ;;  %v4077_v47 = vld [vmem:[%s5235_s18 + $0x178] sm:$0xff]  }
0x13aa   :  { %v1810_v49 = vadd.f32 1e-12, %v1808_v48  ;;  %v4078_v48 = vld [vmem:[%s5235_s18 + $0x88] sm:$0xff]  }
0x13ab   :  { %v1807_v50 = vpop.xlane.xlu1 %1806 }
0x13ac   :  { %4180 = vrsqrt.f32 %v1810_v49  ;;  %v1809_v51 = vmul.f32 0.03125, %v1807_v50  ;;  %v4080_v49 = vld [vmem:[%s5235_s18 + $0xc0] sm:$0xff]  }
0x13ad   :  { %v4082_v50 = vld [vmem:[%s5235_s18 + $0x80] sm:$0xff]  }
0x13ae   :  { %v1811_v52 = vadd.f32 1e-12, %v1809_v51  ;;  %v4085_v51 = vld [vmem:[%s5235_s18 + $0x1f8] sm:$0xff]  }
0x13b0   :  { %4182 = vrsqrt.f32 %v1811_v52  ;;  %v4858_v52 = vsub.s32 4, %v4390_v33 }
0x13b9   :  { %v4181_v53 = vpop.eup %4180 }
0x13ba   :  { %v1814_v55 = vmul.f32 %v4181_v53, %v1798_v7  ;;  %v4058_v7 = vld [vmem:[%s5235_s18 + $0x20] sm:$0xff]  }
0x13bb   :  { %v4863_v53 = vld [vmem:[%s5236_s15] sm:$0xff] }
0x13bc   :  { %v1822_v56 = vmul.f32 %v3524_v54, %v1814_v55  ;;  %v4869_v55 = vsub.s32 5, %v4390_v33 }
0x13bd   :  { %v4183_v57 = vpop.eup %4182 }
0x13be   :  { %v1815_v58 = vmul.f32 %v4183_v57, %v1799_v27  ;;  %v1830_v59 = vadd.f32 %v3525_v46, %v1822_v56  ;;  %v4062_v27 = vld [vmem:[%s5235_s18 + $0x18] sm:$0xff]   ;;  %v1861_v56 = vrot.slane %v4863_v53, %v4397_v37  ;;  %v1877_v57 = vrot.slane %v4863_v53, %v4858_v52 }
0x13c0   :  { %v1823_v38 = vmul.f32 %v3524_v54, %v1815_v58  ;;  %v1832_v60 = vpack.c.bf16 %v1830_v59, %v1830_v59  ;;  %v4866_v54 = vsub.s32 1, %v4390_v33  ;;  %v1881_v58 = vrot.slane %v4863_v53, %v4869_v55 }
0x13c2   :  { %v1831_v0 = vadd.f32 %v3525_v46, %v1823_v38  ;;  %v1910_v63 = vunpack.c.l.b16 %v1832_v60  ;;  %v1865_v46 = vrot.slane %v4863_v53, %v4866_v54 }
0x13c4   :  { %v1833_v61 = vpack.c.bf16 %v1831_v0, %v1831_v0 }
0x13c6   :  { %v1911_v62 = vunpack.c.l.b16 %v1833_v61  ;;  %v4884_v61 = vsub.s32 2, %v4390_v33 }
0x13c8   :  { %v1912_v1 = vrot.slane %v1911_v62, 7 }
0x13ca   :  { %v1914_v2 = vsel %vm1913_vm6, %v1912_v1, %v1910_v63  ;;  %v4887_v1 = vsub.s32 3, %v4390_v33 }
0x13cb   :  { %v1915_v9 = vpack.c.b16 %v1914_v2, %v1914_v2 }
0x13cd   :  { %3546 = vmatmul.mubr.msk.bf16.vlgmr.msra.gmra.mxu1 %vm126_vm1, %v1915_v9  ;;  %3548 = vmatmul.mubr.msk.bf16.vlgmr.msra.gmra.mxu0 %vm126_vm1, %v1915_v9 }
0x13ce   :  { %2073 = vmatpush1.bf16.msra.mxu1 %v4030_v5  ;;  %2196 = vmatpush1.bf16.msra.mxu0 %v4033_v8 }
0x13cf   :  { %2074 = vmatprep.subr.bf16.mxu1 %v4038_v10  ;;  %2197 = vmatprep.subr.bf16.mxu0 %v4041_v11 }
0x13d0   :  { %2092 = vmatprep.mubr.bf16.mxu1 %v4211_v3  ;;  %2215 = vmatprep.mubr.bf16.mxu0 %v4211_v3 }
0x13d2   :  { %2075 = vmatpush1.bf16.msra.mxu1 %v4036_v12  ;;  %2198 = vmatpush1.bf16.msra.mxu0 %v4039_v14 }
0x13d3   :  { %2154 = vmatprep.subr.bf16.mxu1 %v4044_v16  ;;  %3714 = vmatprep.subr.bf16.mxu0 %v4053_v25  ;;  %v1855_v25 = vld [vmem:[%s5236_s15 + $0x8] sm:$0x3] }
0x13d5   :  { %3547 = vmatmul.mubr.msk.bf16.vlgmr.msra.gmra.mxu1 %vm126_vm1, %v1915_v9  ;;  %3550 = vmatmul.mubr.msk.bf16.vlgmr.msra.gmra.mxu0 %vm126_vm1, %v1915_v9 }
0x13d6   :  { %2155 = vmatpush1.bf16.msra.mxu1 %v4042_v13  ;;  %2174 = vmatprep.mubr.bf16.mxu1 %v4211_v3  ;;  %v4067_v3 = vld [vmem:[%s5235_s18 + $0xa0] sm:$0xff]  }
0x13d7   :  { %2156 = vmatprep.subr.bf16.mxu1 %v4047_v17  ;;  %3715 = vmatpush3.bf16.msra.mxu0 %v4055_v6  ;;  %v1869_v17 = vrot.slane %v4863_v53, %v4884_v61  ;;  %v1897_v6 = vrot.slane %v1855_v25, %v4866_v54 }
0x13d8   :  { %3716 = vmatprep.subr.bf16.mxu0 %v4057_v30 }
0x13da   :  { %2157 = vmatpush1.bf16.msra.mxu1 %v4045_v18 }
0x13db   :  { %3692 = vmatprep.subr.bf16.mxu1 %v4048_v15  ;;  %3717 = vmatpush3.bf16.msra.mxu0 %v4059_v31 }
0x13dc   :  { %3718 = vmatprep.subr.bf16.mxu0 %v4061_v26 }
0x13dd   :  { %3549 = vmatmul.mubr.msk.bf16.vlgmr.msra.gmra.mxu1 %vm126_vm1, %v1915_v9 }
0x13de   :  { %3693 = vmatpush3.bf16.msra.mxu1 %v4049_v21 }
0x13df   :  { %3694 = vmatprep.subr.bf16.mxu1 %v4050_v22  ;;  %3719 = vmatpush3.bf16.msra.mxu0 %v4063_v34 }
0x13e0   :  { %3720 = vmatprep.subr.bf16.mxu0 %v4065_v36 }
0x13e2   :  { %3695 = vmatpush3.bf16.msra.mxu1 %v4051_v23 }
0x13e3   :  { %3696 = vmatprep.subr.bf16.mxu1 %v4052_v24  ;;  %3721 = vmatpush3.bf16.msra.mxu0 %v4067_v3 }
0x13e4   :  { %3722 = vmatprep.subr.bf16.mxu0 %v4069_v41 }
0x13e6   :  { %3697 = vmatpush3.bf16.msra.mxu1 %v4054_v28  ;;  %v1873_v28 = vrot.slane %v4863_v53, %v4887_v1 }
0x13e7   :  { %3698 = vmatprep.subr.bf16.mxu1 %v4056_v29  ;;  %3723 = vmatpush3.bf16.msra.mxu0 %v4071_v19 }
0x13e8   :  { %3724 = vmatprep.subr.bf16.mxu0 %v4073_v42 }
0x13ea   :  { %3699 = vmatpush3.bf16.msra.mxu1 %v4058_v7 }
0x13eb   :  { %3700 = vmatprep.subr.bf16.mxu1 %v4060_v32  ;;  %3725 = vmatpush3.bf16.msra.mxu0 %v4075_v44 }
0x13ec   :  { %3726 = vmatprep.subr.bf16.mxu0 %v4076_v45 }
0x13ee   :  { %3701 = vmatpush3.bf16.msra.mxu1 %v4062_v27 }
0x13ef   :  { %3702 = vmatprep.subr.bf16.mxu1 %v4064_v35  ;;  %3727 = vmatpush3.bf16.msra.mxu0 %v4078_v48 }
0x13f0   :  { %3728 = vmatprep.subr.bf16.mxu0 %v4080_v49 }
0x13f2   :  { %3703 = vmatpush3.bf16.msra.mxu1 %v4066_v39 }
0x13f3   :  { %3704 = vmatprep.subr.bf16.mxu1 %v4068_v40  ;;  %3729 = vmatpush3.bf16.msra.mxu0 %v4082_v50 }
0x13f4   :  { %3758 = vmatprep.subr.bf16.mxu0 %v4085_v51 }
0x13f6   :  { %3705 = vmatpush3.bf16.msra.mxu1 %v4070_v4  ;;  %v1893_v4 = vrot.slane %v1855_v25, %v4397_v37 }
0x13f7   :  { %3706 = vmatprep.subr.bf16.mxu1 %v4072_v20 }
0x13fa   :  { %3707 = vmatpush3.bf16.msra.mxu1 %v4074_v43 }
0x13fb   :  { %3736 = vmatprep.subr.bf16.mxu1 %v4077_v47 }
0x148d   :  { %v2053_v38 = vpop.f32.mrf.mxu1  ;;  %v2135_v59 = vpop.f32.mrf.mxu0 }
0x148e   :  { %v4879_v0 = vadd.f32 %v2053_v38, %v1861_v56  ;;  %v4881_v60 = vadd.f32 %v2135_v59, %v1877_v57 }
0x148f   :  { %v2055_v62 = vpop.f32.mrf.mxu1  ;;  %v2137_v63 = vpop.f32.mrf.mxu0 }
0x1490   :  { %v2225_v2 = vsel %vm2224_vm7, %v4879_v0, 0.0  ;;  %v2253_v5 = vsel %vm2224_vm7, %v4881_v60, 0.0  ;;  %v4893_v8 = vadd.f32 %v2055_v62, %v1865_v46  ;;  %v4895_v9 = vadd.f32 %v2137_v63, %v1881_v58 }
0x1491   :  { %v2226_v10 = vrot.slane %v2225_v2, 4  ;;  %v2254_v11 = vrot.slane %v2253_v5, 4  ;;  %v2057_v12 = vpop.f32.mrf.mxu1  ;;  %v2139_v14 = vpop.f32.mrf.mxu0 }
0x1492   :  { %v2232_v16 = vsel %vm2224_vm7, %v4893_v8, 0.0  ;;  %v2260_v13 = vsel %vm2224_vm7, %v4895_v9, 0.0 }
0x1493   :  { %v2227_v18 = vadd.f32 %v2226_v10, %v2225_v2  ;;  %v2255_v15 = vadd.f32 %v2254_v11, %v2253_v5  ;;  %v2233_v21 = vrot.slane %v2232_v16, 4  ;;  %v2261_v22 = vrot.slane %v2260_v13, 4  ;;  %v2058_v23 = vpop.f32.mrf.mxu1  ;;  %v2140_v24 = vpop.f32.mrf.mxu0 }
0x1495   :  { %v2228_v29 = vrot.slane %v2227_v18, 2  ;;  %v2256_v30 = vrot.slane %v2255_v15, 2  ;;  %v2234_v7 = vadd.f32 %v2233_v21, %v2232_v16  ;;  %v2262_v31 = vadd.f32 %v2261_v22, %v2260_v13  ;;  %v2094_v32 = vpop.f32.mrf.mxu1  ;;  %v2217_v26 = vpop.f32.mrf.mxu0 }
0x1496   :  { %v4909_v27 = vadd.f32 %v2094_v32, %v1869_v17  ;;  %v4922_v12 = vadd.f32 %v2217_v26, %v1893_v4 }
0x1497   :  { %v2229_v34 = vadd.f32 %v2228_v29, %v2227_v18  ;;  %v2257_v35 = vadd.f32 %v2256_v30, %v2255_v15  ;;  %v2235_v36 = vrot.slane %v2234_v7, 2  ;;  %v2263_v39 = vrot.slane %v2262_v31, 2  ;;  %v2096_v3 = vpop.f32.mrf.mxu1  ;;  %v2219_v40 = vpop.f32.mrf.mxu0 }
0x1498   :  { %v2239_v41 = vsel %vm2224_vm7, %v4909_v27, 0.0  ;;  %v4914_v19 = vadd.f32 %v2096_v3, %v1873_v28  ;;  %v4916_v20 = vadd.f32 %v2219_v40, %v1897_v6 }
0x1499   :  { %v2230_v42 = vrot.slane %v2229_v34, 1  ;;  %v2258_v43 = vrot.slane %v2257_v35, 1  ;;  %v2236_v44 = vadd.f32 %v2235_v36, %v2234_v7  ;;  %v2264_v45 = vadd.f32 %v2263_v39, %v2262_v31  ;;  %v2098_v47 = vpop.f32.mrf.mxu1  ;;  %v2221_v48 = vpop.f32.mrf.mxu0 }
0x149a   :  { %v2240_v49 = vrot.slane %v2239_v41, 4  ;;  %v2246_v50 = vsel %vm2224_vm7, %v4914_v19, 0.0  ;;  %v2288_v51 = vsel %vm2224_vm7, %v4916_v20, 0.0 }
0x149b   :  { %v2231_v56 = vadd.f32 %v2230_v42, %v2229_v34  ;;  %v2259_v57 = vadd.f32 %v2258_v43, %v2257_v35  ;;  %v2237_v46 = vrot.slane %v2236_v44, 1  ;;  %v2265_v58 = vrot.slane %v2264_v45, 1  ;;  %v2099_v38 = vpop.f32.mrf.mxu1  ;;  %v2222_v59 = vpop.f32.mrf.mxu0 }
0x149c   :  { %v2241_v62 = vadd.f32 %v2240_v49, %v2239_v41  ;;  %v2247_v63 = vrot.slane %v2246_v50, 4  ;;  %v2289_v2 = vrot.slane %v2288_v51, 4 }
0x149d   :  { %v2296_v5 = vmul.f32 0.5, %v2231_v56  ;;  %v2238_v10 = vadd.f32 %v2237_v46, %v2236_v44  ;;  %v2266_v11 = vadd.f32 %v2265_v58, %v2264_v45  ;;  %v4924_v14 = vpop.f32.mrf.mxu1  ;;  %v2300_v16 = vmul.f32 0.5, %v2259_v57 }
0x149e   :  { %v2242_v13 = vrot.slane %v2241_v62, 2  ;;  %v2248_v17 = vadd.f32 %v2247_v63, %v2246_v50  ;;  %v2290_v18 = vadd.f32 %v2289_v2, %v2288_v51 }
0x149f   :  { %v4927_v15 = vsub.f32 %v4879_v0, %v2296_v5  ;;  %v2297_v21 = vmul.f32 0.5, %v2238_v10  ;;  %v2301_v22 = vmul.f32 0.5, %v2266_v11  ;;  %v4929_v23 = vpop.f32.mrf.mxu1  ;;  %v2281_v0 = vsel %vm2224_vm7, %v4922_v12, 0.0 }
0x14a0   :  { %v2243_v24 = vadd.f32 %v2242_v13, %v2241_v62  ;;  %v2249_v25 = vrot.slane %v2248_v17, 2  ;;  %v2291_v28 = vrot.slane %v2290_v18, 2  ;;  %v4942_v31 = vsub.f32 %v4881_v60, %v2300_v16 }
0x14a1   :  { %v2316_v6 = vmul.f32 %v4927_v15, %v4927_v15  ;;  %v4934_v29 = vsub.f32 %v4893_v8, %v2297_v21  ;;  %v4937_v30 = vsub.f32 %v4895_v9, %v2301_v22  ;;  %v2180_v7 = vpop.f32.mrf.mxu1  ;;  %v2282_v40 = vrot.slane %v2281_v0, 4 }
0x14a2   :  { %v2244_v32 = vrot.slane %v2243_v24, 1  ;;  %v2250_v26 = vadd.f32 %v2249_v25, %v2248_v17  ;;  %v2292_v34 = vadd.f32 %v2291_v28, %v2290_v18  ;;  %v2320_v44 = vmul.f32 %v4942_v31, %v4942_v31 }
0x14a3   :  { %v2326_v35 = vsel %vm2224_vm7, %v2316_v6, 0.0  ;;  %v2317_v36 = vmul.f32 %v4934_v29, %v4934_v29  ;;  %v2321_v8 = vmul.f32 %v4937_v30, %v4937_v30  ;;  %v2181_v9 = vpop.f32.mrf.mxu1  ;;  %v2283_v58 = vadd.f32 %v2282_v40, %v2281_v0 }
0x14a4   :  { %v2327_v39 = vrot.slane %v2326_v35, 4  ;;  %v2245_v3 = vadd.f32 %v2244_v32, %v2243_v24  ;;  %v2251_v4 = vrot.slane %v2250_v26, 1  ;;  %v2293_v42 = vrot.slane %v2292_v34, 1 }
0x14a5   :  { %v2333_v41 = vsel %vm2224_vm7, %v2317_v36, 0.0  ;;  %v2361_v60 = vsel %vm2224_vm7, %v2321_v8, 0.0  ;;  %v2354_v63 = vsel %vm2224_vm7, %v2320_v44, 0.0  ;;  %v4969_v21 = vsub.s32 7, %v4390_v33 }
0x14a6   :  { %v2328_v43 = vadd.f32 %v2327_v39, %v2326_v35  ;;  %v2334_v45 = vrot.slane %v2333_v41, 4  ;;  %v2362_v47 = vrot.slane %v2361_v60, 4  ;;  %v2298_v48 = vmul.f32 0.5, %v2245_v3 }
0x14a7   :  { %v2252_v49 = vadd.f32 %v2251_v4, %v2250_v26  ;;  %v2294_v50 = vadd.f32 %v2293_v42, %v2292_v34  ;;  %v2355_v22 = vrot.slane %v2354_v63, 4  ;;  %v2284_v0 = vrot.slane %v2283_v58, 2 }
0x14a8   :  { %v2329_v51 = vrot.slane %v2328_v43, 2  ;;  %v2335_v56 = vadd.f32 %v2334_v45, %v2333_v41  ;;  %v2363_v57 = vadd.f32 %v2362_v47, %v2361_v60  ;;  %v4954_v46 = vsub.f32 %v4909_v27, %v2298_v48 }
0x14a9   :  { %v2299_v38 = vmul.f32 0.5, %v2252_v49  ;;  %v2305_v59 = vmul.f32 0.5, %v2294_v50  ;;  %v4966_v27 = vsub.s32 6, %v4390_v33  ;;  %v1889_v8 = vrot.slane %v4863_v53, %v4969_v21 }
0x14aa   :  { %v2330_v62 = vadd.f32 %v2329_v51, %v2328_v43  ;;  %v2336_v2 = vrot.slane %v2335_v56, 2  ;;  %v2364_v5 = vrot.slane %v2363_v57, 2  ;;  %v2318_v10 = vmul.f32 %v4954_v46, %v4954_v46 }
0x14ab   :  { %v4960_v11 = vsub.f32 %v4914_v19, %v2299_v38  ;;  %v4963_v16 = vsub.f32 %v4916_v20, %v2305_v59  ;;  %v1885_v33 = vrot.slane %v4863_v53, %v4966_v27  ;;  %v2356_v9 = vadd.f32 %v2355_v22, %v2354_v63 }
0x14ac   :  { %v2331_v13 = vrot.slane %v2330_v62, 1  ;;  %v2337_v17 = vadd.f32 %v2336_v2, %v2335_v56  ;;  %v2365_v18 = vadd.f32 %v2364_v5, %v2363_v57  ;;  %v2340_v24 = vsel %vm2224_vm7, %v2318_v10, 0.0 }
0x14ad   :  { %v2319_v25 = vmul.f32 %v4960_v11, %v4960_v11  ;;  %v2325_v19 = vmul.f32 %v4963_v16, %v4963_v16  ;;  %v2341_v7 = vrot.slane %v2340_v24, 4  ;;  %v2285_v42 = vadd.f32 %v2284_v0, %v2283_v58 }
0x14ae   :  { %v2332_v20 = vadd.f32 %v2331_v13, %v2330_v62  ;;  %v2338_v28 = vrot.slane %v2337_v17, 1  ;;  %v2366_v6 = vrot.slane %v2365_v18, 1  ;;  %v4983_v49 = vadd.f32 %v4924_v14, %v1885_v33 }
0x14af   :  { %v2347_v32 = vsel %vm2224_vm7, %v2319_v25, 0.0  ;;  %v2389_v26 = vsel %vm2224_vm7, %v2325_v19, 0.0  ;;  %v2342_v39 = vadd.f32 %v2341_v7, %v2340_v24  ;;  %v2357_v50 = vrot.slane %v2356_v9, 2 }
0x14b0   :  { %v2396_v34 = vmul.f32 0.5, %v2332_v20  ;;  %v2339_v35 = vadd.f32 %v2338_v28, %v2337_v17  ;;  %v2367_v36 = vadd.f32 %v2366_v6, %v2365_v18  ;;  %v2348_v3 = vrot.slane %v2347_v32, 4 }
0x14b1   :  { %v2390_v40 = vrot.slane %v2389_v26, 4  ;;  %v2343_v43 = vrot.slane %v2342_v39, 2  ;;  %v2286_v56 = vrot.slane %v2285_v42, 1  ;;  %v2267_v57 = vsel %vm2224_vm7, %v4983_v49, 0.0 }
0x14b2   :  { %v2406_v41 = vadd.f32 1e-05, %v2396_v34  ;;  %v2397_v60 = vmul.f32 0.5, %v2339_v35  ;;  %v2401_v4 = vmul.f32 0.5, %v2367_v36  ;;  %v2349_v44 = vadd.f32 %v2348_v3, %v2347_v32  ;;  %v4997_v36 = vld [vmem:[%s5238_s17] sm:$0xff] }
0x14b3   :  { %v2391_v45 = vadd.f32 %v2390_v40, %v2389_v26  ;;  %v2344_v51 = vadd.f32 %v2343_v43, %v2342_v39  ;;  %v2179_v38 = vadd.f32 %v4929_v23, %v1889_v8  ;;  %v2268_v63 = vrot.slane %v2267_v57, 4  ;;  %v4992_v23 = vld [vmem:[%s5237_s16] sm:$0xff] }
0x14b4   :  { %4184 = vrsqrt.f32 %v2406_v41  ;;  %v2407_v47 = vadd.f32 1e-05, %v2397_v60  ;;  %v2411_v48 = vadd.f32 1e-05, %v2401_v4  ;;  %v2350_v53 = vrot.slane %v2349_v44, 2 }
0x14b5   :  { %v2345_v58 = vrot.slane %v2344_v51, 1  ;;  %v2392_v62 = vrot.slane %v2391_v45, 2  ;;  %v2274_v2 = vsel %vm2224_vm7, %v2179_v38, 0.0  ;;  %v2358_v5 = vadd.f32 %v2357_v50, %v2356_v9 }
0x14b6   :  { %4186 = vrsqrt.f32 %v2407_v47  ;;  %v2351_v59 = vadd.f32 %v2350_v53, %v2349_v44  ;;  %v2275_v13 = vrot.slane %v2274_v2, 4  ;;  %v2287_v17 = vadd.f32 %v2286_v56, %v2285_v42 }
0x14b7   :  { %4188 = vrsqrt.f32 %v2411_v48  ;;  %v2346_v14 = vadd.f32 %v2345_v58, %v2344_v51  ;;  %v2269_v18 = vadd.f32 %v2268_v63, %v2267_v57  ;;  %v2393_v25 = vadd.f32 %v2392_v62, %v2391_v45 }
0x14b8   :  { %v2352_v10 = vrot.slane %v2351_v59, 1  ;;  %v2276_v19 = vadd.f32 %v2275_v13, %v2274_v2  ;;  %v2359_v28 = vrot.slane %v2358_v5, 1  ;;  %v2304_v32 = vmul.f32 0.5, %v2287_v17 }
0x14b9   :  { %v2398_v22 = vmul.f32 0.5, %v2346_v14  ;;  %v2270_v20 = vrot.slane %v2269_v18, 2  ;;  %v2394_v34 = vrot.slane %v2393_v25, 1  ;;  %v2443_v8 = vrot.slane %v4992_v23, %v4397_v37 }
0x14ba   :  { %v2353_v24 = vadd.f32 %v2352_v10, %v2351_v59  ;;  %v2277_v7 = vrot.slane %v2276_v19, 2  ;;  %v2360_v3 = vadd.f32 %v2359_v28, %v2358_v5  ;;  %v2447_v40 = vrot.slane %v4992_v23, %v4866_v54 }
0x14bb   :  { %v2408_v6 = vadd.f32 1e-05, %v2398_v22  ;;  %v2271_v26 = vadd.f32 %v2270_v20, %v2269_v18  ;;  %v5005_v4 = vsub.f32 %v4922_v12, %v2304_v32  ;;  %v2507_v43 = vrot.slane %v4997_v36, %v4397_v37 }
0x14bc   :  { %v2399_v0 = vmul.f32 0.5, %v2353_v24  ;;  %v2278_v35 = vadd.f32 %v2277_v7, %v2276_v19  ;;  %v2463_v45 = vrot.slane %v4992_v23, %v4869_v55  ;;  %v2395_v47 = vadd.f32 %v2394_v34, %v2393_v25 }
0x14bd   :  { %4190 = vrsqrt.f32 %v2408_v6  ;;  %v2272_v9 = vrot.slane %v2271_v26, 1  ;;  %v2400_v12 = vmul.f32 0.5, %v2360_v3  ;;  %v2527_v59 = vrot.slane %v4997_v36, %v4869_v55 }
0x14be   :  { %v2409_v33 = vadd.f32 1e-05, %v2399_v0  ;;  %v2279_v41 = vrot.slane %v2278_v35, 1  ;;  %v2324_v63 = vmul.f32 %v5005_v4, %v5005_v4  ;;  %v2405_v14 = vmul.f32 0.5, %v2395_v47 }
0x14bf   :  { %v2273_v42 = vadd.f32 %v2272_v9, %v2271_v26  ;;  %v2410_v17 = vadd.f32 1e-05, %v2400_v12  ;;  %v2451_v24 = vrot.slane %v4992_v23, %v4884_v61  ;;  %v2455_v7 = vrot.slane %v4992_v23, %v4887_v1 }
0x14c0   :  { %4192 = vrsqrt.f32 %v2409_v33  ;;  %v2280_v48 = vadd.f32 %v2279_v41, %v2278_v35  ;;  %v4079_v33 = vld [vmem:[%s5235_s18 + $0x138] sm:$0xff]   ;;  %v2515_v34 = vrot.slane %v4997_v36, %v4884_v61 }
0x14c1   :  { %v4185_v39 = vpop.eup %4184  ;;  %v2302_v56 = vmul.f32 0.5, %v2273_v42  ;;  %4194 = vrsqrt.f32 %v2410_v17  ;;  %v2519_v42 = vrot.slane %v4997_v36, %v4887_v1  ;;  %v4084_v1 = vld [vmem:[%s5235_s18 + $0x168] sm:$0xff]  }
0x14c2   :  { %v2426_v60 = vmul.f32 %v4185_v39, %v4927_v15  ;;  %v2511_v15 = vrot.slane %v4997_v36, %v4866_v54  ;;  %v2303_v58 = vmul.f32 0.5, %v2280_v48  ;;  %v4081_v39 = vld [vmem:[%s5235_s18 + $0x170] sm:$0xff]  }
0x14c3   :  { %v4187_v44 = vpop.eup %4186  ;;  %v5020_v2 = vsub.f32 %v4983_v49, %v2302_v56  ;;  %v2382_v49 = vsel %vm2224_vm7, %v2324_v63, 0.0 }
0x14c4   :  { %v4189_v50 = vpop.eup %4188  ;;  %v2490_v51 = vmul.f32 %v2443_v8, %v2426_v60  ;;  %v2427_v53 = vmul.f32 %v4187_v44, %v4934_v29  ;;  %v5022_v10 = vsub.f32 %v2179_v38, %v2303_v58  ;;  %v2415_v38 = vadd.f32 1e-05, %v2405_v14 }
0x14c5   :  { %v2431_v57 = vmul.f32 %v4189_v50, %v4937_v30  ;;  %v2322_v13 = vmul.f32 %v5020_v2, %v5020_v2 }
0x14c6   :  { %v2491_v62 = vmul.f32 %v2447_v40, %v2427_v53  ;;  %v2554_v5 = vadd.f32 %v2507_v43, %v2490_v51  ;;  %v2323_v55 = vmul.f32 %v5022_v10, %v5022_v10  ;;  %v2383_v40 = vrot.slane %v2382_v49, 4 }
0x14c7   :  { %v2495_v29 = vmul.f32 %v2463_v45, %v2431_v57  ;;  %v2368_v25 = vsel %vm2224_vm7, %v2322_v13, 0.0  ;;  %4196 = vrsqrt.f32 %v2415_v38  ;;  %v4083_v45 = vld [vmem:[%s5235_s18 + $0x130] sm:$0xff]   ;;  %v4086_v57 = vld [vmem:[%s5235_s18 + $0x128] sm:$0xff]   ;;  %v4087_v13 = vld [vmem:[%s5235_s18 + $0x1b8] sm:$0xff]  }
0x14c8   :  { %v2555_v30 = vadd.f32 %v2511_v15, %v2491_v62  ;;  %v2564_v18 = vmax.f32 %v2554_v5, 0.0  ;;  %v2369_v20 = vrot.slane %v2368_v25, 4  ;;  %v2375_v28 = vsel %vm2224_vm7, %v2323_v55, 0.0  ;;  %v4088_v62 = vld [vmem:[%s5235_s18 + $0x160] sm:$0xff]   ;;  %v4089_v55 = vld [vmem:[%s5235_s18 + $0x1f0] sm:$0xff]  }
0x14c9   :  { %v2559_v22 = vadd.f32 %v2527_v59, %v2495_v29  ;;  %v2376_v32 = vrot.slane %v2375_v28, 4  ;;  %v2384_v51 = vadd.f32 %v2383_v40, %v2382_v49  ;;  %v4091_v38 = vld [vmem:[%s5235_s18 + $0x1b0] sm:$0xff]  }
0x14ca   :  { %v2565_v19 = vmax.f32 %v2555_v30, 0.0  ;;  %v4191_v0 = vpop.eup %4190  ;;  %v2370_v8 = vadd.f32 %v2369_v20, %v2368_v25  ;;  %v2574_v9 = vpack.c.bf16 %v2564_v18, %v2564_v18  ;;  %v4090_v18 = vld [vmem:[%s5235_s18 + $0x120] sm:$0xff]  }
0x14cb   :  { %v2569_v6 = vmax.f32 %v2559_v22, 0.0  ;;  %v2428_v35 = vmul.f32 %v4191_v0, %v4954_v46  ;;  %v2377_v41 = vadd.f32 %v2376_v32, %v2375_v28  ;;  %v2385_v63 = vrot.slane %v2384_v51, 2  ;;  %v4093_v28 = vld [vmem:[%s5235_s18 + $0x1e8] sm:$0xff]   ;;  %v4096_v32 = vld [vmem:[%s5235_s18 + $0x150] sm:$0xff]  }
0x14cc   :  { %v2575_v26 = vpack.c.bf16 %v2565_v19, %v2565_v19  ;;  %v2371_v44 = vrot.slane %v2370_v8, 2 }
0x14cd   :  { %v4193_v3 = vpop.eup %4192  ;;  %v2579_v60 = vpack.c.bf16 %v2569_v6, %v2569_v6  ;;  %v2492_v43 = vmul.f32 %v2451_v24, %v2428_v35  ;;  %v2378_v46 = vrot.slane %v2377_v41, 2  ;;  %v4092_v24 = vld [vmem:[%s5235_s18 + $0x158] sm:$0xff]   ;;  %v2386_v25 = vadd.f32 %v2385_v63, %v2384_v51  ;;  %v4105_v51 = vld [vmem:[%s5235_s18 + $0x1d0] sm:$0xff]  }
0x14ce   :  { %3263 = vmatprep.mubr.bf16.mxu1 %v2575_v26  ;;  %v2429_v61 = vmul.f32 %v4193_v3, %v4960_v11  ;;  %v2372_v48 = vadd.f32 %v2371_v44, %v2370_v8  ;;  %v4195_v49 = vpop.eup %4194  ;;  %v4094_v6 = vld [vmem:[%s5235_s18 + $0x118] sm:$0xff]   ;;  %v4097_v8 = vld [vmem:[%s5235_s18 + $0x1e0] sm:$0xff]   ;;  %v2523_v3 = vrot.slane %v4997_v36, %v4858_v52 }
0x14cf   :  { %3264 = vmatmul.mubr.bf16.vlgmr.msra.gmra.mxu1 %v2574_v9  ;;  %v2556_v50 = vadd.f32 %v2515_v34, %v2492_v43  ;;  %v2379_v11 = vadd.f32 %v2378_v46, %v2377_v41  ;;  %v2430_v0 = vmul.f32 %v4195_v49, %v4942_v31  ;;  %v2387_v26 = vrot.slane %v2386_v25, 1  ;;  %v4095_v31 = vld [vmem:[%s5235_s18 + $0x1a8] sm:$0xff]   ;;  %v4098_v9 = vld [vmem:[%s5235_s18 + $0x110] sm:$0xff]   ;;  %v4104_v44 = vld [vmem:[%s5235_s18 + $0x140] sm:$0xff]  }
0x14d0   :  { %3737 = vmatpush3.bf16.msra.mxu1 %v4079_v33  ;;  %3343 = vmatprep.mubr.bf16.mxu1 %v2579_v60  ;;  %v2493_v47 = vmul.f32 %v2455_v7, %v2429_v61  ;;  %v2373_v53 = vrot.slane %v2372_v48, 1  ;;  %v2459_v7 = vrot.slane %v4992_v23, %v4858_v52  ;;  %v5089_v33 = vld [vmem:[%s5237_s16 + $0x8] sm:$0x3]  ;;  %v4101_v52 = vld [vmem:[%s5235_s18 + $0x1d8] sm:$0xff]   ;;  %v4114_v49 = vld [vmem:[%s5235_s18 + $0x180] sm:$0xff]  }
0x14d1   :  { %3738 = vmatprep.subr.bf16.mxu1 %v4081_v39  ;;  %v2380_v15 = vrot.slane %v2379_v11, 1  ;;  %v2566_v12 = vmax.f32 %v2556_v50, 0.0  ;;  %v2479_v35 = vrot.slane %v5089_v33, %v4866_v54  ;;  %v2388_v40 = vadd.f32 %v2387_v26, %v2386_v25  ;;  %v5111_v41 = vld [vmem:[%s5238_s17 + $0x8] sm:$0x3] }
0x14d2   :  { %v2557_v56 = vadd.f32 %v2519_v42, %v2493_v47  ;;  %v2374_v58 = vadd.f32 %v2373_v53, %v2372_v48  ;;  %v2494_v39 = vmul.f32 %v2459_v7, %v2430_v0  ;;  %v4099_v42 = vld [vmem:[%s5235_s18 + $0x1a0] sm:$0xff]   ;;  %v2543_v43 = vrot.slane %v5111_v41, %v4866_v54  ;;  %v4102_v61 = vld [vmem:[%s5235_s18 + $0x108] sm:$0xff]   ;;  %v4103_v54 = vld [vmem:[%s5235_s18 + $0x198] sm:$0xff]  }
0x14d3   :  { %v2381_v5 = vadd.f32 %v2380_v15, %v2379_v11  ;;  %v2576_v17 = vpack.c.bf16 %v2566_v12, %v2566_v12  ;;  %v2471_v50 = vrot.slane %v4992_v23, %v4969_v21  ;;  %v4106_v11 = vld [vmem:[%s5235_s18 + $0x100] sm:$0xff]   ;;  %v4109_v12 = vld [vmem:[%s5235_s18 + $0x278] sm:$0xff]   ;;  %v2475_v26 = vrot.slane %v5089_v33, %v4397_v37  ;;  %v4125_v33 = vld [vmem:[%s5235_s18 + $0x208] sm:$0xff]  }
0x14d4   :  { %3739 = vmatpush3.bf16.msra.mxu1 %v4083_v45  ;;  %v2567_v59 = vmax.f32 %v2557_v56, 0.0  ;;  %v2402_v29 = vmul.f32 0.5, %v2374_v58  ;;  %v4197_v20 = vpop.eup %4196  ;;  %v2558_v46 = vadd.f32 %v2523_v3, %v2494_v39  ;;  %v2404_v45 = vmul.f32 0.5, %v2388_v40  ;;  %v4121_v7 = vld [vmem:[%s5235_s18 + $0x218] sm:$0xff]  }
0x14d5   :  { %3740 = vmatprep.subr.bf16.mxu1 %v4084_v1  ;;  %v2403_v30 = vmul.f32 0.5, %v2381_v5  ;;  %v2435_v34 = vmul.f32 %v4197_v20, %v4963_v16  ;;  %v4100_v16 = vld [vmem:[%s5235_s18 + $0x148] sm:$0xff]   ;;  %v2467_v1 = vrot.slane %v4992_v23, %v4966_v27  ;;  %v2535_v58 = vrot.slane %v4997_v36, %v4969_v21 }
0x14d6   :  { %v2577_v14 = vpack.c.bf16 %v2567_v59, %v2567_v59  ;;  %v2412_v22 = vadd.f32 1e-05, %v2402_v29  ;;  %v2568_v15 = vmax.f32 %v2558_v46, 0.0  ;;  %v2414_v23 = vadd.f32 1e-05, %v2404_v45  ;;  %v4107_v59 = vld [vmem:[%s5235_s18 + $0x190] sm:$0xff]  }
0x14d7   :  { %v2413_v19 = vadd.f32 1e-05, %v2403_v30  ;;  %v2499_v60 = vmul.f32 %v2479_v35, %v2435_v34  ;;  %v4108_v5 = vld [vmem:[%s5235_s18 + $0x1c8] sm:$0xff]   ;;  %v2531_v21 = vrot.slane %v4997_v36, %v4966_v27  ;;  %v4112_v27 = vld [vmem:[%s5235_s18 + $0x1c0] sm:$0xff]   ;;  %v4122_v34 = vld [vmem:[%s5235_s18 + $0x250] sm:$0xff]  }
0x14d8   :  { %3741 = vmatpush3.bf16.msra.mxu1 %v4086_v57  ;;  %3303 = vmatprep.mubr.bf16.mxu0 %v2577_v14  ;;  %4198 = vrsqrt.f32 %v2412_v22  ;;  %v2578_v29 = vpack.c.bf16 %v2568_v15, %v2568_v15  ;;  %v4113_v14 = vld [vmem:[%s5235_s18 + $0x270] sm:$0xff]   ;;  %v4110_v30 = vld [vmem:[%s5235_s18 + $0x188] sm:$0xff]  }
0x14d9   :  { %3742 = vmatprep.subr.bf16.mxu1 %v4088_v62  ;;  %3304 = vmatmul.mubr.bf16.vlgmr.msra.gmra.mxu0 %v2576_v17  ;;  %4200 = vrsqrt.f32 %v2413_v19  ;;  %v2563_v47 = vadd.f32 %v2543_v43, %v2499_v60  ;;  %v4117_v19 = vld [vmem:[%s5235_s18 + $0x228] sm:$0xff]   ;;  %v4123_v35 = vld [vmem:[%s5235_s18 + $0x210] sm:$0xff]  }
0x14da   :  { %3759 = vmatpush3.bf16.msra.mxu0 %v4087_v13  ;;  %4202 = vrsqrt.f32 %v2414_v23 }
0x14db   :  { %3760 = vmatprep.subr.bf16.mxu0 %v4089_v55  ;;  %v2573_v62 = vmax.f32 %v2563_v47, 0.0 }
0x14dc   :  { %3743 = vmatpush3.bf16.msra.mxu1 %v4090_v18  ;;  %v4115_v18 = vld [vmem:[%s5235_s18 + $0x230] sm:$0xff]  }
0x14dd   :  { %3744 = vmatprep.subr.bf16.mxu1 %v4092_v24  ;;  %v2583_v17 = vpack.c.bf16 %v2573_v62, %v2573_v62  ;;  %v4116_v24 = vld [vmem:[%s5235_s18 + $0x268] sm:$0xff]  }
0x14de   :  { %3761 = vmatpush3.bf16.msra.mxu0 %v4091_v38  ;;  %v4118_v38 = vld [vmem:[%s5235_s18 + $0x260] sm:$0xff]  }
0x14df   :  { %3762 = vmatprep.subr.bf16.mxu0 %v4093_v28  ;;  %v4119_v28 = vld [vmem:[%s5235_s18 + $0x220] sm:$0xff]  }
0x14e0   :  { %3745 = vmatpush3.bf16.msra.mxu1 %v4094_v6  ;;  %v4120_v6 = vld [vmem:[%s5235_s18 + $0x258] sm:$0xff]  }
0x14e1   :  { %3746 = vmatprep.subr.bf16.mxu1 %v4096_v32 }
0x14e2   :  { %3763 = vmatpush3.bf16.msra.mxu0 %v4095_v31 }
0x14e3   :  { %3764 = vmatprep.subr.bf16.mxu0 %v4097_v8  ;;  %v2539_v8 = vrot.slane %v5111_v41, %v4397_v37  ;;  %v4127_v37 = vld [vmem:[%s5235_s18 + $0x200] sm:$0xff]  }
0x14e4   :  { %3747 = vmatpush3.bf16.msra.mxu1 %v4098_v9  ;;  %v4126_v9 = vld [vmem:[%s5235_s18 + $0x240] sm:$0xff]  }
0x14e5   :  { %3748 = vmatprep.subr.bf16.mxu1 %v4100_v16  ;;  %v4199_v48 = vpop.eup %4198 }
0x14e6   :  { %3765 = vmatpush3.bf16.msra.mxu0 %v4099_v42  ;;  %v4201_v53 = vpop.eup %4200  ;;  %v2432_v56 = vmul.f32 %v4199_v48, %v5020_v2 }
0x14e7   :  { %3766 = vmatprep.subr.bf16.mxu0 %v4101_v52  ;;  %v2433_v57 = vmul.f32 %v4201_v53, %v5022_v10  ;;  %v4111_v10 = vld [vmem:[%s5235_s18 + $0x238] sm:$0xff]   ;;  %v4203_v0 = vpop.eup %4202  ;;  %v3551_v53 = vld [vmem:[%s5239_s19] ss:$0 sm:$0xff] }
0x14e8   :  { %3749 = vmatpush3.bf16.msra.mxu1 %v4102_v61  ;;  %v2496_v63 = vmul.f32 %v2467_v1, %v2432_v56  ;;  %v2434_v32 = vmul.f32 %v4203_v0, %v5005_v4  ;;  %v4124_v4 = vld [vmem:[%s5235_s18 + $0x248] sm:$0xff]  }
0x14e9   :  { %3750 = vmatprep.subr.bf16.mxu1 %v4104_v44  ;;  %v2497_v2 = vmul.f32 %v2471_v50, %v2433_v57 }
0x14ea   :  { %3767 = vmatpush3.bf16.msra.mxu0 %v4103_v54  ;;  %v2560_v36 = vadd.f32 %v2531_v21, %v2496_v63  ;;  %v2498_v31 = vmul.f32 %v2475_v26, %v2434_v32 }
0x14eb   :  { %3768 = vmatprep.subr.bf16.mxu0 %v4105_v51  ;;  %v2561_v13 = vadd.f32 %v2535_v58, %v2497_v2 }
0x14ec   :  { %3751 = vmatpush3.bf16.msra.mxu1 %v4106_v11  ;;  %v2570_v25 = vmax.f32 %v2560_v36, 0.0  ;;  %v2562_v39 = vadd.f32 %v2539_v8, %v2498_v31 }
0x14ed   :  { %3780 = vmatprep.subr.bf16.mxu1 %v4109_v12  ;;  %v2571_v55 = vmax.f32 %v2561_v13, 0.0 }
0x14ee   :  { %3769 = vmatpush3.bf16.msra.mxu0 %v4107_v59  ;;  %v2580_v20 = vpack.c.bf16 %v2570_v25, %v2570_v25  ;;  %v2572_v16 = vmax.f32 %v2562_v39, 0.0 }
0x14ef   :  { %3344 = vmatmul.mubr.bf16.vlgmr.msra.gmra.mxu1 %v2578_v29  ;;  %3770 = vmatprep.subr.bf16.mxu0 %v4108_v5  ;;  %v2581_v22 = vpack.c.bf16 %v2571_v55, %v2571_v55 }
0x14f0   :  { %3781 = vmatpush3.bf16.msra.mxu1 %v4111_v10  ;;  %3423 = vmatprep.mubr.bf16.mxu1 %v2583_v17  ;;  %v2582_v3 = vpack.c.bf16 %v2572_v16, %v2572_v16 }
0x14f1   :  { %3782 = vmatprep.subr.bf16.mxu1 %v4113_v14  ;;  %3383 = vmatprep.mubr.bf16.mxu0 %v2581_v22 }
0x14f2   :  { %3771 = vmatpush3.bf16.msra.mxu0 %v4110_v30 }
0x14f3   :  { %3772 = vmatprep.subr.bf16.mxu0 %v4112_v27 }
0x14f4   :  { %3783 = vmatpush3.bf16.msra.mxu1 %v4115_v18 }
0x14f5   :  { %3784 = vmatprep.subr.bf16.mxu1 %v4116_v24 }
0x14f6   :  { %3773 = vmatpush3.bf16.msra.mxu0 %v4114_v49 }
0x14f8   :  { %3785 = vmatpush3.bf16.msra.mxu1 %v4117_v19 }
0x14f9   :  { %3384 = vmatmul.mubr.bf16.vlgmr.msra.gmra.mxu0 %v2580_v20  ;;  %3786 = vmatprep.subr.bf16.mxu1 %v4118_v38 }
0x14fc   :  { %3787 = vmatpush3.bf16.msra.mxu1 %v4119_v28 }
0x14fd   :  { %3788 = vmatprep.subr.bf16.mxu1 %v4120_v6 }
0x1500   :  { %3789 = vmatpush3.bf16.msra.mxu1 %v4121_v7 }
0x1501   :  { %3790 = vmatprep.subr.bf16.mxu1 %v4122_v34 }
0x1504   :  { %3791 = vmatpush3.bf16.msra.mxu1 %v4123_v35 }
0x1505   :  { %3792 = vmatprep.subr.bf16.mxu1 %v4124_v4 }
0x1508   :  { %3793 = vmatpush3.bf16.msra.mxu1 %v4125_v33 }
0x1509   :  { %3794 = vmatprep.subr.bf16.mxu1 %v4126_v9 }
0x150c   :  { %3795 = vmatpush3.bf16.msra.mxu1 %v4127_v37 }
0x150f   :  { %3424 = vmatmul.mubr.bf16.vlgmr.msra.gmra.mxu1 %v2582_v3 }
0x158f   :  { %v3708_v40 = vpop.f32.mrf.mxu1 }
0x1591   :  { %v3709_v41 = vpop.f32.mrf.mxu1 }
0x1592   :  { %v3710_v11 = vadd.f32 %v3709_v41, %v3708_v40 }
0x1593   :  { %v3711_v60 = vpop.f32.mrf.mxu1 }
0x1594   :  { %v3266_v15 = vadd.f32 %v3710_v11, %v3551_v53 }
0x1595   :  { %v3712_v42 = vpop.f32.mrf.mxu1 }
0x1599   :  { %v3730_v43 = vpop.f32.mrf.mxu0 }
0x159b   :  { %v3731_v52 = vpop.f32.mrf.mxu0 }
0x159c   :  { %v3732_v56 = vadd.f32 %v3731_v52, %v3730_v43 }
0x159d   :  { %v3733_v61 = vpop.f32.mrf.mxu0 }
0x159e   :  { %v3306_v23 = vadd.f32 %v3732_v56, %v3266_v15 }
0x159f   :  { %v3734_v44 = vpop.f32.mrf.mxu0 }
0x15af   :  { %v3752_v46 = vpop.f32.mrf.mxu1 }
0x15b1   :  { %v3753_v45 = vpop.f32.mrf.mxu1 }
0x15b2   :  { %v3754_v12 = vadd.f32 %v3753_v45, %v3752_v46 }
0x15b3   :  { %v3755_v54 = vpop.f32.mrf.mxu1 }
0x15b4   :  { %v3346_v59 = vadd.f32 %v3754_v12, %v3306_v23 }
0x15b5   :  { %v3756_v47 = vpop.f32.mrf.mxu1 }
0x15b9   :  { %v3774_v48 = vpop.f32.mrf.mxu0 }
0x15bb   :  { %v3775_v1 = vpop.f32.mrf.mxu0 }
0x15bc   :  { %v3776_v57 = vadd.f32 %v3775_v1, %v3774_v48 }
0x15bd   :  { %v3777_v50 = vpop.f32.mrf.mxu0 }
0x15be   :  { %v3386_v63 = vadd.f32 %v3776_v57, %v3346_v59 }
0x15bf   :  { %v3778_v51 = vpop.f32.mrf.mxu0 }
0x15cf   :  { %v3796_v58 = vpop.f32.mrf.mxu1 }
0x15d1   :  { %v3797_v62 = vpop.f32.mrf.mxu1 }
0x15d2   :  { %v3798_v2 = vadd.f32 %v3797_v62, %v3796_v58 }
0x15d3   :  { %v3799_v5 = vpop.f32.mrf.mxu1 }
0x15d4   :  { %v3426_v10 = vadd.f32 %v3798_v2, %v3386_v63 }
0x15d5   :  { %v3800_v21 = vpop.f32.mrf.mxu1 }
0x15d6   :  { %3432 = vst.msk [vmem:[%s5240_s20] sm:$0x3] %vm3431_vm8, %v3426_v10 }

</bundles_post_ra>
